<compile_context>
chip_gen: v5e
topology: v5e:2x2
jax: 0.10.0
libtpu: 0.0.40
codegen_flags: <defaults>
</compile_context>

<pallas_src>
import math
from functools import partial

import jax
import jax.numpy as jnp
from jax.experimental import pallas as pl
from jax.experimental.pallas import tpu as pltpu

# ----------------------------- model config ---------------------------------
NUM_LAYERS = 2
B, S, D = 2, 8, 32          # batch, seq, embed dim
H = 4                       # num heads
DH = D // H                 # head dim
FF = 64                     # feedforward hidden dim
LN_EPS = 1e-5


# ------------------------------ Pallas kernel -------------------------------
def _layer_norm(y, g, b):
    # Single-pass LN: var = E[y^2] - mu^2 (one reduction chain shorter).
    mu = jnp.mean(y, axis=-1, keepdims=True)
    var = jnp.mean(y * y, axis=-1, keepdims=True) - mu * mu
    return (y - mu) * jax.lax.rsqrt(var + LN_EPS) * g + b


def encoder_kernel(x_ref, wslab_ref, w2t_ref, bias_ref, o_ref, *, num_layers):
    # ---- hoist all weight / bias reads out of the shared-weight layer loop --
    wslab = wslab_ref[...]                     # (D, 3D + D + FF)
    wqkv_t = wslab[:, 0:3 * D]                 # (D, 3D)  == Wqkv^T
    wo_t = wslab[:, 3 * D:4 * D]               # (D, D)   == Wo^T
    w1t = wslab[:, 4 * D:4 * D + FF]           # (D, FF)  == W1^T
    w2t = w2t_ref[...]                         # (FF, D)  == W2^T

    bias = bias_ref[...]                       # (8, 128) packed slab
    bqkv = bias[0:1, 0:3 * D]                  # (1, 3D)
    bo = bias[1:2, 0:D]                        # (1, D)
    b1 = bias[2:3, 0:FF]                       # (1, FF)
    b2 = bias[3:4, 0:D]                        # (1, D)
    g1 = bias[4:5, 0:D]
    be1 = bias[5:6, 0:D]
    g2 = bias[6:7, 0:D]
    be2 = bias[7:8, 0:D]

    scale = 1.0 / math.sqrt(DH)
    x = x_ref[...].astype(jnp.float32).reshape(B * S, D)        # (B*S, D)

    # All layers share one weight set (ModuleList([block] * num_layers)).
    for _ in range(num_layers):
        # ---- fused QKV projection: one (B*S, D) x (D, 3D) matmul ----
        qkv = jnp.dot(x, wqkv_t, preferred_element_type=jnp.float32) + bqkv

        # Split heads with static slices into a (B*H, S, DH) batch axis.
        def heads(off):
            return jnp.stack(
                [qkv[b * S:(b + 1) * S, off + h * DH: off + (h + 1) * DH]
                 for b in range(B) for h in range(H)], axis=0)

        q3 = heads(0)          # (B*H, S, DH)
        k3 = heads(D)
        v3 = heads(2 * D)

        # ---- attention scores / softmax / context (batched over B*H) ----
        logits = jnp.einsum('nsk,ntk->nst', q3, k3,
                            preferred_element_type=jnp.float32) * scale
        logits = logits - jnp.max(logits, axis=-1, keepdims=True)
        p = jnp.exp(logits)
        p = p / jnp.sum(p, axis=-1, keepdims=True)               # exact softmax

        ctx = jnp.einsum('nst,ntk->nsk', p, v3,
                         preferred_element_type=jnp.float32)     # (B*H, S, DH)

        # Re-concatenate heads -> (B*S, D), then ONE output-projection matmul.
        ctx2 = jnp.concatenate(
            [jnp.concatenate([ctx[b * H + h] for h in range(H)], axis=-1)
             for b in range(B)], axis=0)                         # (B*S, D)
        attn = jnp.dot(ctx2, wo_t, preferred_element_type=jnp.float32) + bo

        # ---- residual + LayerNorm 1 ----
        y = _layer_norm(x + attn, g1, be1)

        # ---- feed-forward (weights pre-transposed on host) ----
        h1 = jnp.dot(y, w1t, preferred_element_type=jnp.float32) + b1
        h1 = jnp.maximum(h1, 0.0)                                # ReLU
        ff = jnp.dot(h1, w2t, preferred_element_type=jnp.float32) + b2

        # ---- residual + LayerNorm 2 ----
        x = _layer_norm(y + ff, g2, be2)

    o_ref[...] = x.reshape(B, S, D).astype(o_ref.dtype)


# ------------------------------ wrapper --------------------------------------
def prepare_params(params):
    """One-time host-side packing of PyTorch-layout weights into slabs.

    - Pre-transpose all Linear weights (PyTorch y = x @ W.T + b).
    - Pack Wqkv^T | Wo^T | W1^T into one (D, 3D+D+FF) slab, keep W2^T separate.
    - Pack every bias / LayerNorm vector into a single (8, 128) f32 slab
      (one vreg tile, one DMA).
    """
    (wqkv, bqkv, wo, bo, w1, b1, w2, b2, ln1w, ln1b, ln2w, ln2b) = params
    w_slab = jnp.concatenate([wqkv.T, wo.T, w1.T], axis=1)   # (D, 3D + D + FF)
    w2t = w2.T                                               # (FF, D)

    bias = jnp.zeros((8, 128), jnp.float32)
    bias = bias.at[0, 0:3 * D].set(bqkv)
    bias = bias.at[1, 0:D].set(bo)
    bias = bias.at[2, 0:FF].set(b1)
    bias = bias.at[3, 0:D].set(b2)
    bias = bias.at[4, 0:D].set(ln1w)
    bias = bias.at[5, 0:D].set(ln1b)
    bias = bias.at[6, 0:D].set(ln2w)
    bias = bias.at[7, 0:D].set(ln2b)
    return w_slab, w2t, bias


def _full_spec(shape):
    # Whole-array block, constant across the (single-step) grid.
    return pl.BlockSpec(shape, lambda i, nd=len(shape): (0,) * nd)


def transformer_encoder(x, params, num_layers=NUM_LAYERS):
    w_slab, w2t, bias = prepare_params(params)
    return pl.pallas_call(
        partial(encoder_kernel, num_layers=num_layers),
        out_shape=jax.ShapeDtypeStruct((B, S, D), x.dtype),
        grid_spec=pltpu.PrefetchScalarGridSpec(
            num_scalar_prefetch=0,
            grid=(1,),                                  # whole batch in one step
            in_specs=[_full_spec((B, S, D)),
                      _full_spec(w_slab.shape),
                      _full_spec(w2t.shape),
                      _full_spec(bias.shape)],
            out_specs=_full_spec((B, S, D)),
        ),
        compiler_params=pltpu.CompilerParams(
            dimension_semantics=("arbitrary",)),
    )(x, w_slab, w2t, bias)


# --------------------------- pure-JAX reference ------------------------------
def _ln_ref(y, w, b):
    mu = jnp.mean(y, -1, keepdims=True)
    var = jnp.mean((y - mu) ** 2, -1, keepdims=True)
    return (y - mu) / jnp.sqrt(var + LN_EPS) * w + b


def reference_block(x, params):
    (wqkv, bqkv, wo, bo, w1, b1, w2, b2, ln1w, ln1b, ln2w, ln2b) = params
    qkv = x @ wqkv.T + bqkv
    q, k, v = qkv[..., :D], qkv[..., D:2 * D], qkv[..., 2 * D:]
    qh = q.reshape(B, S, H, DH).transpose(0, 2, 1, 3)
    kh = k.reshape(B, S, H, DH).transpose(0, 2, 1, 3)
    vh = v.reshape(B, S, H, DH).transpose(0, 2, 1, 3)
    logits = jnp.einsum("bhsd,bhtd->bhst", qh, kh) / math.sqrt(DH)
    p = jax.nn.softmax(logits, axis=-1)
    attn = jnp.einsum("bhst,bhtd->bhsd", p, vh).transpose(0, 2, 1, 3).reshape(B, S, D)
    attn = attn @ wo.T + bo
    y = _ln_ref(x + attn, ln1w, ln1b)
    ff = jnp.maximum(y @ w1.T + b1, 0.0) @ w2.T + b2
    return _ln_ref(y + ff, ln2w, ln2b)


def reference_encoder(x, params, num_layers=NUM_LAYERS):
    for _ in range(num_layers):
        x = reference_block(x, params)
    return x


# ------------------------------- main ----------------------------------------
if __name__ == "__main__":
    key = jax.random.PRNGKey(0)
    ks = jax.random.split(key, 10)

    x = jax.random.normal(ks[0], (B, S, D), dtype=jnp.float32)

    init = lambda k, shape: 0.05 * jax.random.normal(k, shape, dtype=jnp.float32)
    params = (
        init(ks[1], (3 * D, D)), init(ks[2], (3 * D,)),   # qkv_proj (PyTorch layout)
        init(ks[3], (D, D)),     init(ks[4], (D,)),       # o_proj
        init(ks[5], (FF, D)),    init(ks[6], (FF,)),      # ffn linear1
        init(ks[7], (D, FF)),    init(ks[8], (D,)),       # ffn linear2
        jnp.ones((D,), jnp.float32), jnp.zeros((D,), jnp.float32),  # ln1
        jnp.ones((D,), jnp.float32), jnp.zeros((D,), jnp.float32),  # ln2
    )

    out = jax.jit(transformer_encoder)(x, params)
    out = jax.block_until_ready(out)

    ref = reference_encoder(x, params)
    assert out.shape == (B, S, D)
    # Exact-f32 math everywhere (approx reciprocal removed) -> tight tolerance.
    assert jnp.allclose(out, ref, atol=1e-4, rtol=1e-4), "mismatch vs reference"

    print("KERNEL_OK")
</pallas_src>

<mosaic_0001>
module attributes {stable_mosaic.version = 11 : i64} {
  func.func @encoder_kernel(%arg0: i32, %arg1: memref<2x8x32xf32, #tpu.memory_space<vmem>>, %arg2: memref<32x192xf32, #tpu.memory_space<vmem>>, %arg3: memref<64x32xf32, #tpu.memory_space<vmem>>, %arg4: memref<8x128xf32, #tpu.memory_space<vmem>>, %arg5: memref<2x8x32xf32, #tpu.memory_space<vmem>>) attributes {dimension_semantics = [#tpu.dimension_semantics<arbitrary>], iteration_bounds = array<i64: 1>, scalar_prefetch = 0 : i64, scratch_operands = 0 : i64, tpu.core_type = #tpu.core_type<tc>, window_params = [{pipeline_mode = #tpu.pipeline_mode<synchronous>, transform_indices = @transform_0, window_bounds = array<i64: 2, 8, 32>}, {pipeline_mode = #tpu.pipeline_mode<synchronous>, transform_indices = @transform_1, window_bounds = array<i64: 32, 192>}, {pipeline_mode = #tpu.pipeline_mode<synchronous>, transform_indices = @transform_2, window_bounds = array<i64: 64, 32>}, {pipeline_mode = #tpu.pipeline_mode<synchronous>, transform_indices = @transform_3, window_bounds = array<i64: 8, 128>}, {pipeline_mode = #tpu.pipeline_mode<synchronous>, transform_indices = @transform_4, window_bounds = array<i64: 2, 8, 32>}]} {
    %c0 = arith.constant 0 : index
    %c0_0 = arith.constant 0 : index
    %0 = vector.load %arg2[%c0, %c0_0] : memref<32x192xf32, #tpu.memory_space<vmem>>, vector<32x192xf32>
    %1 = vector.extract_strided_slice %0 {offsets = [0, 0], sizes = [32, 96], strides = [1, 1]} : vector<32x192xf32> to vector<32x96xf32>
    %2 = vector.extract_strided_slice %0 {offsets = [0, 96], sizes = [32, 32], strides = [1, 1]} : vector<32x192xf32> to vector<32x32xf32>
    %3 = vector.extract_strided_slice %0 {offsets = [0, 128], sizes = [32, 64], strides = [1, 1]} : vector<32x192xf32> to vector<32x64xf32>
    %c0_1 = arith.constant 0 : index
    %c0_2 = arith.constant 0 : index
    %4 = vector.load %arg3[%c0_1, %c0_2] : memref<64x32xf32, #tpu.memory_space<vmem>>, vector<64x32xf32>
    %c0_3 = arith.constant 0 : index
    %c0_4 = arith.constant 0 : index
    %5 = vector.load %arg4[%c0_3, %c0_4] : memref<8x128xf32, #tpu.memory_space<vmem>>, vector<8x128xf32>
    %6 = vector.extract_strided_slice %5 {offsets = [0, 0], sizes = [1, 96], strides = [1, 1]} : vector<8x128xf32> to vector<1x96xf32>
    %7 = vector.extract_strided_slice %5 {offsets = [1, 0], sizes = [1, 32], strides = [1, 1]} : vector<8x128xf32> to vector<1x32xf32>
    %8 = vector.extract_strided_slice %5 {offsets = [2, 0], sizes = [1, 64], strides = [1, 1]} : vector<8x128xf32> to vector<1x64xf32>
    %9 = vector.extract_strided_slice %5 {offsets = [3, 0], sizes = [1, 32], strides = [1, 1]} : vector<8x128xf32> to vector<1x32xf32>
    %10 = vector.extract_strided_slice %5 {offsets = [4, 0], sizes = [1, 32], strides = [1, 1]} : vector<8x128xf32> to vector<1x32xf32>
    %11 = vector.extract_strided_slice %5 {offsets = [5, 0], sizes = [1, 32], strides = [1, 1]} : vector<8x128xf32> to vector<1x32xf32>
    %12 = vector.extract_strided_slice %5 {offsets = [6, 0], sizes = [1, 32], strides = [1, 1]} : vector<8x128xf32> to vector<1x32xf32>
    %13 = vector.extract_strided_slice %5 {offsets = [7, 0], sizes = [1, 32], strides = [1, 1]} : vector<8x128xf32> to vector<1x32xf32>
    %c0_5 = arith.constant 0 : index
    %c0_6 = arith.constant 0 : index
    %c0_7 = arith.constant 0 : index
    %14 = vector.load %arg1[%c0_5, %c0_6, %c0_7] : memref<2x8x32xf32, #tpu.memory_space<vmem>>, vector<2x8x32xf32>
    %15 = vector.shape_cast %14 : vector<2x8x32xf32> to vector<16x32xf32>
    %cst = arith.constant dense<0.000000e+00> : vector<16x96xf32>
    %16 = tpu.matmul %15, %1, %cst {dimension_numbers = #tpu.dot_dimension_numbers<[1], [0], [0], [1], [0, 0, 1, 1], [], []>} : vector<16x32xf32>, vector<32x96xf32>, vector<16x96xf32> -> vector<16x96xf32>
    %17 = vector.broadcast %6 : vector<1x96xf32> to vector<16x96xf32>
    %18 = arith.addf %16, %17 : vector<16x96xf32>
    %19 = vector.extract_strided_slice %18 {offsets = [0, 0], sizes = [8, 8], strides = [1, 1]} : vector<16x96xf32> to vector<8x8xf32>
    %20 = vector.extract_strided_slice %18 {offsets = [0, 8], sizes = [8, 8], strides = [1, 1]} : vector<16x96xf32> to vector<8x8xf32>
    %21 = vector.extract_strided_slice %18 {offsets = [0, 16], sizes = [8, 8], strides = [1, 1]} : vector<16x96xf32> to vector<8x8xf32>
    %22 = vector.extract_strided_slice %18 {offsets = [0, 24], sizes = [8, 8], strides = [1, 1]} : vector<16x96xf32> to vector<8x8xf32>
    %23 = vector.extract_strided_slice %18 {offsets = [8, 0], sizes = [8, 8], strides = [1, 1]} : vector<16x96xf32> to vector<8x8xf32>
    %24 = vector.extract_strided_slice %18 {offsets = [8, 8], sizes = [8, 8], strides = [1, 1]} : vector<16x96xf32> to vector<8x8xf32>
    %25 = vector.extract_strided_slice %18 {offsets = [8, 16], sizes = [8, 8], strides = [1, 1]} : vector<16x96xf32> to vector<8x8xf32>
    %26 = vector.extract_strided_slice %18 {offsets = [8, 24], sizes = [8, 8], strides = [1, 1]} : vector<16x96xf32> to vector<8x8xf32>
    %27 = vector.shape_cast %19 : vector<8x8xf32> to vector<1x8x8xf32>
    %28 = vector.shape_cast %20 : vector<8x8xf32> to vector<1x8x8xf32>
    %29 = vector.shape_cast %21 : vector<8x8xf32> to vector<1x8x8xf32>
    %30 = vector.shape_cast %22 : vector<8x8xf32> to vector<1x8x8xf32>
    %31 = vector.shape_cast %23 : vector<8x8xf32> to vector<1x8x8xf32>
    %32 = vector.shape_cast %24 : vector<8x8xf32> to vector<1x8x8xf32>
    %33 = vector.shape_cast %25 : vector<8x8xf32> to vector<1x8x8xf32>
    %34 = vector.shape_cast %26 : vector<8x8xf32> to vector<1x8x8xf32>
    %35 = tpu.concatenate %27, %28, %29, %30, %31, %32, %33, %34 in 0 : vector<1x8x8xf32>, vector<1x8x8xf32>, vector<1x8x8xf32>, vector<1x8x8xf32>, vector<1x8x8xf32>, vector<1x8x8xf32>, vector<1x8x8xf32>, vector<1x8x8xf32> -> vector<8x8x8xf32>
    %36 = vector.extract_strided_slice %18 {offsets = [0, 32], sizes = [8, 8], strides = [1, 1]} : vector<16x96xf32> to vector<8x8xf32>
    %37 = vector.extract_strided_slice %18 {offsets = [0, 40], sizes = [8, 8], strides = [1, 1]} : vector<16x96xf32> to vector<8x8xf32>
    %38 = vector.extract_strided_slice %18 {offsets = [0, 48], sizes = [8, 8], strides = [1, 1]} : vector<16x96xf32> to vector<8x8xf32>
    %39 = vector.extract_strided_slice %18 {offsets = [0, 56], sizes = [8, 8], strides = [1, 1]} : vector<16x96xf32> to vector<8x8xf32>
    %40 = vector.extract_strided_slice %18 {offsets = [8, 32], sizes = [8, 8], strides = [1, 1]} : vector<16x96xf32> to vector<8x8xf32>
    %41 = vector.extract_strided_slice %18 {offsets = [8, 40], sizes = [8, 8], strides = [1, 1]} : vector<16x96xf32> to vector<8x8xf32>
    %42 = vector.extract_strided_slice %18 {offsets = [8, 48], sizes = [8, 8], strides = [1, 1]} : vector<16x96xf32> to vector<8x8xf32>
    %43 = vector.extract_strided_slice %18 {offsets = [8, 56], sizes = [8, 8], strides = [1, 1]} : vector<16x96xf32> to vector<8x8xf32>
    %44 = vector.shape_cast %36 : vector<8x8xf32> to vector<1x8x8xf32>
    %45 = vector.shape_cast %37 : vector<8x8xf32> to vector<1x8x8xf32>
    %46 = vector.shape_cast %38 : vector<8x8xf32> to vector<1x8x8xf32>
    %47 = vector.shape_cast %39 : vector<8x8xf32> to vector<1x8x8xf32>
    %48 = vector.shape_cast %40 : vector<8x8xf32> to vector<1x8x8xf32>
    %49 = vector.shape_cast %41 : vector<8x8xf32> to vector<1x8x8xf32>
    %50 = vector.shape_cast %42 : vector<8x8xf32> to vector<1x8x8xf32>
    %51 = vector.shape_cast %43 : vector<8x8xf32> to vector<1x8x8xf32>
    %52 = tpu.concatenate %44, %45, %46, %47, %48, %49, %50, %51 in 0 : vector<1x8x8xf32>, vector<1x8x8xf32>, vector<1x8x8xf32>, vector<1x8x8xf32>, vector<1x8x8xf32>, vector<1x8x8xf32>, vector<1x8x8xf32>, vector<1x8x8xf32> -> vector<8x8x8xf32>
    %53 = vector.extract_strided_slice %18 {offsets = [0, 64], sizes = [8, 8], strides = [1, 1]} : vector<16x96xf32> to vector<8x8xf32>
    %54 = vector.extract_strided_slice %18 {offsets = [0, 72], sizes = [8, 8], strides = [1, 1]} : vector<16x96xf32> to vector<8x8xf32>
    %55 = vector.extract_strided_slice %18 {offsets = [0, 80], sizes = [8, 8], strides = [1, 1]} : vector<16x96xf32> to vector<8x8xf32>
    %56 = vector.extract_strided_slice %18 {offsets = [0, 88], sizes = [8, 8], strides = [1, 1]} : vector<16x96xf32> to vector<8x8xf32>
    %57 = vector.extract_strided_slice %18 {offsets = [8, 64], sizes = [8, 8], strides = [1, 1]} : vector<16x96xf32> to vector<8x8xf32>
    %58 = vector.extract_strided_slice %18 {offsets = [8, 72], sizes = [8, 8], strides = [1, 1]} : vector<16x96xf32> to vector<8x8xf32>
    %59 = vector.extract_strided_slice %18 {offsets = [8, 80], sizes = [8, 8], strides = [1, 1]} : vector<16x96xf32> to vector<8x8xf32>
    %60 = vector.extract_strided_slice %18 {offsets = [8, 88], sizes = [8, 8], strides = [1, 1]} : vector<16x96xf32> to vector<8x8xf32>
    %61 = vector.shape_cast %53 : vector<8x8xf32> to vector<1x8x8xf32>
    %62 = vector.shape_cast %54 : vector<8x8xf32> to vector<1x8x8xf32>
    %63 = vector.shape_cast %55 : vector<8x8xf32> to vector<1x8x8xf32>
    %64 = vector.shape_cast %56 : vector<8x8xf32> to vector<1x8x8xf32>
    %65 = vector.shape_cast %57 : vector<8x8xf32> to vector<1x8x8xf32>
    %66 = vector.shape_cast %58 : vector<8x8xf32> to vector<1x8x8xf32>
    %67 = vector.shape_cast %59 : vector<8x8xf32> to vector<1x8x8xf32>
    %68 = vector.shape_cast %60 : vector<8x8xf32> to vector<1x8x8xf32>
    %69 = tpu.concatenate %61, %62, %63, %64, %65, %66, %67, %68 in 0 : vector<1x8x8xf32>, vector<1x8x8xf32>, vector<1x8x8xf32>, vector<1x8x8xf32>, vector<1x8x8xf32>, vector<1x8x8xf32>, vector<1x8x8xf32>, vector<1x8x8xf32> -> vector<8x8x8xf32>
    "tpu.trace_start"() <{level = 10 : i32, message = "nsk,ntk->nst"}> : () -> ()
    %cst_8 = arith.constant dense<0.000000e+00> : vector<8x8x8xf32>
    %70 = tpu.matmul %35, %52, %cst_8 {dimension_numbers = #tpu.dot_dimension_numbers<[2], [2], [1], [1], [0, 0, 0, 1, 1, 1], [0], [0]>} : vector<8x8x8xf32>, vector<8x8x8xf32>, vector<8x8x8xf32> -> vector<8x8x8xf32>
    "tpu.trace_stop"() : () -> ()
    %cst_9 = arith.constant 0.353553385 : f32
    %71 = vector.broadcast %cst_9 : f32 to vector<8x8x8xf32>
    %72 = arith.mulf %70, %71 : vector<8x8x8xf32>
    %cst_10 = arith.constant dense<0xFF800000> : vector<8x8xf32>
    %73 = vector.multi_reduction <maximumf>, %72, %cst_10 [2] : vector<8x8x8xf32> to vector<8x8xf32>
    %74 = vector.shape_cast %73 : vector<8x8xf32> to vector<8x8x1xf32>
    %75 = vector.broadcast %74 : vector<8x8x1xf32> to vector<8x8x8xf32>
    %76 = arith.subf %72, %75 : vector<8x8x8xf32>
    %77 = math.exp %76 : vector<8x8x8xf32>
    %cst_11 = arith.constant dense<0.000000e+00> : vector<8x8xf32>
    %78 = vector.multi_reduction <add>, %77, %cst_11 [2] : vector<8x8x8xf32> to vector<8x8xf32>
    %79 = vector.shape_cast %78 : vector<8x8xf32> to vector<8x8x1xf32>
    %80 = vector.broadcast %79 : vector<8x8x1xf32> to vector<8x8x8xf32>
    %81 = arith.divf %77, %80 : vector<8x8x8xf32>
    "tpu.trace_start"() <{level = 10 : i32, message = "nst,ntk->nsk"}> : () -> ()
    %cst_12 = arith.constant dense<0.000000e+00> : vector<8x8x8xf32>
    %82 = tpu.matmul %81, %69, %cst_12 {dimension_numbers = #tpu.dot_dimension_numbers<[2], [1], [1], [2], [0, 0, 0, 1, 1, 2], [0], [0]>} : vector<8x8x8xf32>, vector<8x8x8xf32>, vector<8x8x8xf32> -> vector<8x8x8xf32>
    "tpu.trace_stop"() : () -> ()
    %83 = vector.extract_strided_slice %82 {offsets = [0, 0, 0], sizes = [1, 8, 8], strides = [1, 1, 1]} : vector<8x8x8xf32> to vector<1x8x8xf32>
    %84 = vector.shape_cast %83 : vector<1x8x8xf32> to vector<8x8xf32>
    %85 = vector.extract_strided_slice %82 {offsets = [1, 0, 0], sizes = [1, 8, 8], strides = [1, 1, 1]} : vector<8x8x8xf32> to vector<1x8x8xf32>
    %86 = vector.shape_cast %85 : vector<1x8x8xf32> to vector<8x8xf32>
    %87 = vector.extract_strided_slice %82 {offsets = [2, 0, 0], sizes = [1, 8, 8], strides = [1, 1, 1]} : vector<8x8x8xf32> to vector<1x8x8xf32>
    %88 = vector.shape_cast %87 : vector<1x8x8xf32> to vector<8x8xf32>
    %89 = vector.extract_strided_slice %82 {offsets = [3, 0, 0], sizes = [1, 8, 8], strides = [1, 1, 1]} : vector<8x8x8xf32> to vector<1x8x8xf32>
    %90 = vector.shape_cast %89 : vector<1x8x8xf32> to vector<8x8xf32>
    %91 = tpu.concatenate %84, %86, %88, %90 in 1 : vector<8x8xf32>, vector<8x8xf32>, vector<8x8xf32>, vector<8x8xf32> -> vector<8x32xf32>
    %92 = vector.extract_strided_slice %82 {offsets = [4, 0, 0], sizes = [1, 8, 8], strides = [1, 1, 1]} : vector<8x8x8xf32> to vector<1x8x8xf32>
    %93 = vector.shape_cast %92 : vector<1x8x8xf32> to vector<8x8xf32>
    %94 = vector.extract_strided_slice %82 {offsets = [5, 0, 0], sizes = [1, 8, 8], strides = [1, 1, 1]} : vector<8x8x8xf32> to vector<1x8x8xf32>
    %95 = vector.shape_cast %94 : vector<1x8x8xf32> to vector<8x8xf32>
    %96 = vector.extract_strided_slice %82 {offsets = [6, 0, 0], sizes = [1, 8, 8], strides = [1, 1, 1]} : vector<8x8x8xf32> to vector<1x8x8xf32>
    %97 = vector.shape_cast %96 : vector<1x8x8xf32> to vector<8x8xf32>
    %98 = vector.extract_strided_slice %82 {offsets = [7, 0, 0], sizes = [1, 8, 8], strides = [1, 1, 1]} : vector<8x8x8xf32> to vector<1x8x8xf32>
    %99 = vector.shape_cast %98 : vector<1x8x8xf32> to vector<8x8xf32>
    %100 = tpu.concatenate %93, %95, %97, %99 in 1 : vector<8x8xf32>, vector<8x8xf32>, vector<8x8xf32>, vector<8x8xf32> -> vector<8x32xf32>
    %101 = tpu.concatenate %91, %100 in 0 : vector<8x32xf32>, vector<8x32xf32> -> vector<16x32xf32>
    %cst_13 = arith.constant dense<0.000000e+00> : vector<16x32xf32>
    %102 = tpu.matmul %101, %2, %cst_13 {dimension_numbers = #tpu.dot_dimension_numbers<[1], [0], [0], [1], [0, 0, 1, 1], [], []>} : vector<16x32xf32>, vector<32x32xf32>, vector<16x32xf32> -> vector<16x32xf32>
    %103 = vector.broadcast %7 : vector<1x32xf32> to vector<16x32xf32>
    %104 = arith.addf %102, %103 : vector<16x32xf32>
    %105 = arith.addf %15, %104 : vector<16x32xf32>
    %cst_14 = arith.constant dense<0.000000e+00> : vector<16xf32>
    %106 = vector.multi_reduction <add>, %105, %cst_14 [1] : vector<16x32xf32> to vector<16xf32>
    %107 = vector.shape_cast %106 : vector<16xf32> to vector<16x1xf32>
    %cst_15 = arith.constant 3.200000e+01 : f32
    %108 = vector.broadcast %cst_15 : f32 to vector<16x1xf32>
    %109 = arith.divf %107, %108 : vector<16x1xf32>
    %110 = arith.mulf %105, %105 : vector<16x32xf32>
    %cst_16 = arith.constant dense<0.000000e+00> : vector<16xf32>
    %111 = vector.multi_reduction <add>, %110, %cst_16 [1] : vector<16x32xf32> to vector<16xf32>
    %112 = vector.shape_cast %111 : vector<16xf32> to vector<16x1xf32>
    %cst_17 = arith.constant 3.200000e+01 : f32
    %113 = vector.broadcast %cst_17 : f32 to vector<16x1xf32>
    %114 = arith.divf %112, %113 : vector<16x1xf32>
    %115 = arith.mulf %109, %109 : vector<16x1xf32>
    %116 = arith.subf %114, %115 : vector<16x1xf32>
    %117 = vector.broadcast %109 : vector<16x1xf32> to vector<16x32xf32>
    %118 = arith.subf %105, %117 : vector<16x32xf32>
    %cst_18 = arith.constant 9.99999974E-6 : f32
    %119 = vector.broadcast %cst_18 : f32 to vector<16x1xf32>
    %120 = arith.addf %116, %119 : vector<16x1xf32>
    %121 = math.rsqrt %120 : vector<16x1xf32>
    %122 = vector.broadcast %121 : vector<16x1xf32> to vector<16x32xf32>
    %123 = arith.mulf %118, %122 : vector<16x32xf32>
    %124 = vector.broadcast %10 : vector<1x32xf32> to vector<16x32xf32>
    %125 = arith.mulf %123, %124 : vector<16x32xf32>
    %126 = vector.broadcast %11 : vector<1x32xf32> to vector<16x32xf32>
    %127 = arith.addf %125, %126 : vector<16x32xf32>
    %cst_19 = arith.constant dense<0.000000e+00> : vector<16x64xf32>
    %128 = tpu.matmul %127, %3, %cst_19 {dimension_numbers = #tpu.dot_dimension_numbers<[1], [0], [0], [1], [0, 0, 1, 1], [], []>} : vector<16x32xf32>, vector<32x64xf32>, vector<16x64xf32> -> vector<16x64xf32>
    %129 = vector.broadcast %8 : vector<1x64xf32> to vector<16x64xf32>
    %130 = arith.addf %128, %129 : vector<16x64xf32>
    %cst_20 = arith.constant 0.000000e+00 : f32
    %131 = vector.broadcast %cst_20 : f32 to vector<16x64xf32>
    %132 = arith.maximumf %130, %131 : vector<16x64xf32>
    %cst_21 = arith.constant dense<0.000000e+00> : vector<16x32xf32>
    %133 = tpu.matmul %132, %4, %cst_21 {dimension_numbers = #tpu.dot_dimension_numbers<[1], [0], [0], [1], [0, 0, 1, 1], [], []>} : vector<16x64xf32>, vector<64x32xf32>, vector<16x32xf32> -> vector<16x32xf32>
    %134 = vector.broadcast %9 : vector<1x32xf32> to vector<16x32xf32>
    %135 = arith.addf %133, %134 : vector<16x32xf32>
    %136 = arith.addf %127, %135 : vector<16x32xf32>
    %cst_22 = arith.constant dense<0.000000e+00> : vector<16xf32>
    %137 = vector.multi_reduction <add>, %136, %cst_22 [1] : vector<16x32xf32> to vector<16xf32>
    %138 = vector.shape_cast %137 : vector<16xf32> to vector<16x1xf32>
    %cst_23 = arith.constant 3.200000e+01 : f32
    %139 = vector.broadcast %cst_23 : f32 to vector<16x1xf32>
    %140 = arith.divf %138, %139 : vector<16x1xf32>
    %141 = arith.mulf %136, %136 : vector<16x32xf32>
    %cst_24 = arith.constant dense<0.000000e+00> : vector<16xf32>
    %142 = vector.multi_reduction <add>, %141, %cst_24 [1] : vector<16x32xf32> to vector<16xf32>
    %143 = vector.shape_cast %142 : vector<16xf32> to vector<16x1xf32>
    %cst_25 = arith.constant 3.200000e+01 : f32
    %144 = vector.broadcast %cst_25 : f32 to vector<16x1xf32>
    %145 = arith.divf %143, %144 : vector<16x1xf32>
    %146 = arith.mulf %140, %140 : vector<16x1xf32>
    %147 = arith.subf %145, %146 : vector<16x1xf32>
    %148 = vector.broadcast %140 : vector<16x1xf32> to vector<16x32xf32>
    %149 = arith.subf %136, %148 : vector<16x32xf32>
    %cst_26 = arith.constant 9.99999974E-6 : f32
    %150 = vector.broadcast %cst_26 : f32 to vector<16x1xf32>
    %151 = arith.addf %147, %150 : vector<16x1xf32>
    %152 = math.rsqrt %151 : vector<16x1xf32>
    %153 = vector.broadcast %152 : vector<16x1xf32> to vector<16x32xf32>
    %154 = arith.mulf %149, %153 : vector<16x32xf32>
    %155 = vector.broadcast %12 : vector<1x32xf32> to vector<16x32xf32>
    %156 = arith.mulf %154, %155 : vector<16x32xf32>
    %157 = vector.broadcast %13 : vector<1x32xf32> to vector<16x32xf32>
    %158 = arith.addf %156, %157 : vector<16x32xf32>
    %cst_27 = arith.constant dense<0.000000e+00> : vector<16x96xf32>
    %159 = tpu.matmul %158, %1, %cst_27 {dimension_numbers = #tpu.dot_dimension_numbers<[1], [0], [0], [1], [0, 0, 1, 1], [], []>} : vector<16x32xf32>, vector<32x96xf32>, vector<16x96xf32> -> vector<16x96xf32>
    %160 = vector.broadcast %6 : vector<1x96xf32> to vector<16x96xf32>
    %161 = arith.addf %159, %160 : vector<16x96xf32>
    %162 = vector.extract_strided_slice %161 {offsets = [0, 0], sizes = [8, 8], strides = [1, 1]} : vector<16x96xf32> to vector<8x8xf32>
    %163 = vector.extract_strided_slice %161 {offsets = [0, 8], sizes = [8, 8], strides = [1, 1]} : vector<16x96xf32> to vector<8x8xf32>
    %164 = vector.extract_strided_slice %161 {offsets = [0, 16], sizes = [8, 8], strides = [1, 1]} : vector<16x96xf32> to vector<8x8xf32>
    %165 = vector.extract_strided_slice %161 {offsets = [0, 24], sizes = [8, 8], strides = [1, 1]} : vector<16x96xf32> to vector<8x8xf32>
    %166 = vector.extract_strided_slice %161 {offsets = [8, 0], sizes = [8, 8], strides = [1, 1]} : vector<16x96xf32> to vector<8x8xf32>
    %167 = vector.extract_strided_slice %161 {offsets = [8, 8], sizes = [8, 8], strides = [1, 1]} : vector<16x96xf32> to vector<8x8xf32>
    %168 = vector.extract_strided_slice %161 {offsets = [8, 16], sizes = [8, 8], strides = [1, 1]} : vector<16x96xf32> to vector<8x8xf32>
    %169 = vector.extract_strided_slice %161 {offsets = [8, 24], sizes = [8, 8], strides = [1, 1]} : vector<16x96xf32> to vector<8x8xf32>
    %170 = vector.shape_cast %162 : vector<8x8xf32> to vector<1x8x8xf32>
    %171 = vector.shape_cast %163 : vector<8x8xf32> to vector<1x8x8xf32>
    %172 = vector.shape_cast %164 : vector<8x8xf32> to vector<1x8x8xf32>
    %173 = vector.shape_cast %165 : vector<8x8xf32> to vector<1x8x8xf32>
    %174 = vector.shape_cast %166 : vector<8x8xf32> to vector<1x8x8xf32>
    %175 = vector.shape_cast %167 : vector<8x8xf32> to vector<1x8x8xf32>
    %176 = vector.shape_cast %168 : vector<8x8xf32> to vector<1x8x8xf32>
    %177 = vector.shape_cast %169 : vector<8x8xf32> to vector<1x8x8xf32>
    %178 = tpu.concatenate %170, %171, %172, %173, %174, %175, %176, %177 in 0 : vector<1x8x8xf32>, vector<1x8x8xf32>, vector<1x8x8xf32>, vector<1x8x8xf32>, vector<1x8x8xf32>, vector<1x8x8xf32>, vector<1x8x8xf32>, vector<1x8x8xf32> -> vector<8x8x8xf32>
    %179 = vector.extract_strided_slice %161 {offsets = [0, 32], sizes = [8, 8], strides = [1, 1]} : vector<16x96xf32> to vector<8x8xf32>
    %180 = vector.extract_strided_slice %161 {offsets = [0, 40], sizes = [8, 8], strides = [1, 1]} : vector<16x96xf32> to vector<8x8xf32>
    %181 = vector.extract_strided_slice %161 {offsets = [0, 48], sizes = [8, 8], strides = [1, 1]} : vector<16x96xf32> to vector<8x8xf32>
    %182 = vector.extract_strided_slice %161 {offsets = [0, 56], sizes = [8, 8], strides = [1, 1]} : vector<16x96xf32> to vector<8x8xf32>
    %183 = vector.extract_strided_slice %161 {offsets = [8, 32], sizes = [8, 8], strides = [1, 1]} : vector<16x96xf32> to vector<8x8xf32>
    %184 = vector.extract_strided_slice %161 {offsets = [8, 40], sizes = [8, 8], strides = [1, 1]} : vector<16x96xf32> to vector<8x8xf32>
    %185 = vector.extract_strided_slice %161 {offsets = [8, 48], sizes = [8, 8], strides = [1, 1]} : vector<16x96xf32> to vector<8x8xf32>
    %186 = vector.extract_strided_slice %161 {offsets = [8, 56], sizes = [8, 8], strides = [1, 1]} : vector<16x96xf32> to vector<8x8xf32>
    %187 = vector.shape_cast %179 : vector<8x8xf32> to vector<1x8x8xf32>
    %188 = vector.shape_cast %180 : vector<8x8xf32> to vector<1x8x8xf32>
    %189 = vector.shape_cast %181 : vector<8x8xf32> to vector<1x8x8xf32>
    %190 = vector.shape_cast %182 : vector<8x8xf32> to vector<1x8x8xf32>
    %191 = vector.shape_cast %183 : vector<8x8xf32> to vector<1x8x8xf32>
    %192 = vector.shape_cast %184 : vector<8x8xf32> to vector<1x8x8xf32>
    %193 = vector.shape_cast %185 : vector<8x8xf32> to vector<1x8x8xf32>
    %194 = vector.shape_cast %186 : vector<8x8xf32> to vector<1x8x8xf32>
    %195 = tpu.concatenate %187, %188, %189, %190, %191, %192, %193, %194 in 0 : vector<1x8x8xf32>, vector<1x8x8xf32>, vector<1x8x8xf32>, vector<1x8x8xf32>, vector<1x8x8xf32>, vector<1x8x8xf32>, vector<1x8x8xf32>, vector<1x8x8xf32> -> vector<8x8x8xf32>
    %196 = vector.extract_strided_slice %161 {offsets = [0, 64], sizes = [8, 8], strides = [1, 1]} : vector<16x96xf32> to vector<8x8xf32>
    %197 = vector.extract_strided_slice %161 {offsets = [0, 72], sizes = [8, 8], strides = [1, 1]} : vector<16x96xf32> to vector<8x8xf32>
    %198 = vector.extract_strided_slice %161 {offsets = [0, 80], sizes = [8, 8], strides = [1, 1]} : vector<16x96xf32> to vector<8x8xf32>
    %199 = vector.extract_strided_slice %161 {offsets = [0, 88], sizes = [8, 8], strides = [1, 1]} : vector<16x96xf32> to vector<8x8xf32>
    %200 = vector.extract_strided_slice %161 {offsets = [8, 64], sizes = [8, 8], strides = [1, 1]} : vector<16x96xf32> to vector<8x8xf32>
    %201 = vector.extract_strided_slice %161 {offsets = [8, 72], sizes = [8, 8], strides = [1, 1]} : vector<16x96xf32> to vector<8x8xf32>
    %202 = vector.extract_strided_slice %161 {offsets = [8, 80], sizes = [8, 8], strides = [1, 1]} : vector<16x96xf32> to vector<8x8xf32>
    %203 = vector.extract_strided_slice %161 {offsets = [8, 88], sizes = [8, 8], strides = [1, 1]} : vector<16x96xf32> to vector<8x8xf32>
    %204 = vector.shape_cast %196 : vector<8x8xf32> to vector<1x8x8xf32>
    %205 = vector.shape_cast %197 : vector<8x8xf32> to vector<1x8x8xf32>
    %206 = vector.shape_cast %198 : vector<8x8xf32> to vector<1x8x8xf32>
    %207 = vector.shape_cast %199 : vector<8x8xf32> to vector<1x8x8xf32>
    %208 = vector.shape_cast %200 : vector<8x8xf32> to vector<1x8x8xf32>
    %209 = vector.shape_cast %201 : vector<8x8xf32> to vector<1x8x8xf32>
    %210 = vector.shape_cast %202 : vector<8x8xf32> to vector<1x8x8xf32>
    %211 = vector.shape_cast %203 : vector<8x8xf32> to vector<1x8x8xf32>
    %212 = tpu.concatenate %204, %205, %206, %207, %208, %209, %210, %211 in 0 : vector<1x8x8xf32>, vector<1x8x8xf32>, vector<1x8x8xf32>, vector<1x8x8xf32>, vector<1x8x8xf32>, vector<1x8x8xf32>, vector<1x8x8xf32>, vector<1x8x8xf32> -> vector<8x8x8xf32>
    "tpu.trace_start"() <{level = 10 : i32, message = "nsk,ntk->nst"}> : () -> ()
    %cst_28 = arith.constant dense<0.000000e+00> : vector<8x8x8xf32>
    %213 = tpu.matmul %178, %195, %cst_28 {dimension_numbers = #tpu.dot_dimension_numbers<[2], [2], [1], [1], [0, 0, 0, 1, 1, 1], [0], [0]>} : vector<8x8x8xf32>, vector<8x8x8xf32>, vector<8x8x8xf32> -> vector<8x8x8xf32>
    "tpu.trace_stop"() : () -> ()
    %cst_29 = arith.constant 0.353553385 : f32
    %214 = vector.broadcast %cst_29 : f32 to vector<8x8x8xf32>
    %215 = arith.mulf %213, %214 : vector<8x8x8xf32>
    %cst_30 = arith.constant dense<0xFF800000> : vector<8x8xf32>
    %216 = vector.multi_reduction <maximumf>, %215, %cst_30 [2] : vector<8x8x8xf32> to vector<8x8xf32>
    %217 = vector.shape_cast %216 : vector<8x8xf32> to vector<8x8x1xf32>
    %218 = vector.broadcast %217 : vector<8x8x1xf32> to vector<8x8x8xf32>
    %219 = arith.subf %215, %218 : vector<8x8x8xf32>
    %220 = math.exp %219 : vector<8x8x8xf32>
    %cst_31 = arith.constant dense<0.000000e+00> : vector<8x8xf32>
    %221 = vector.multi_reduction <add>, %220, %cst_31 [2] : vector<8x8x8xf32> to vector<8x8xf32>
    %222 = vector.shape_cast %221 : vector<8x8xf32> to vector<8x8x1xf32>
    %223 = vector.broadcast %222 : vector<8x8x1xf32> to vector<8x8x8xf32>
    %224 = arith.divf %220, %223 : vector<8x8x8xf32>
    "tpu.trace_start"() <{level = 10 : i32, message = "nst,ntk->nsk"}> : () -> ()
    %cst_32 = arith.constant dense<0.000000e+00> : vector<8x8x8xf32>
    %225 = tpu.matmul %224, %212, %cst_32 {dimension_numbers = #tpu.dot_dimension_numbers<[2], [1], [1], [2], [0, 0, 0, 1, 1, 2], [0], [0]>} : vector<8x8x8xf32>, vector<8x8x8xf32>, vector<8x8x8xf32> -> vector<8x8x8xf32>
    "tpu.trace_stop"() : () -> ()
    %226 = vector.extract_strided_slice %225 {offsets = [0, 0, 0], sizes = [1, 8, 8], strides = [1, 1, 1]} : vector<8x8x8xf32> to vector<1x8x8xf32>
    %227 = vector.shape_cast %226 : vector<1x8x8xf32> to vector<8x8xf32>
    %228 = vector.extract_strided_slice %225 {offsets = [1, 0, 0], sizes = [1, 8, 8], strides = [1, 1, 1]} : vector<8x8x8xf32> to vector<1x8x8xf32>
    %229 = vector.shape_cast %228 : vector<1x8x8xf32> to vector<8x8xf32>
    %230 = vector.extract_strided_slice %225 {offsets = [2, 0, 0], sizes = [1, 8, 8], strides = [1, 1, 1]} : vector<8x8x8xf32> to vector<1x8x8xf32>
    %231 = vector.shape_cast %230 : vector<1x8x8xf32> to vector<8x8xf32>
    %232 = vector.extract_strided_slice %225 {offsets = [3, 0, 0], sizes = [1, 8, 8], strides = [1, 1, 1]} : vector<8x8x8xf32> to vector<1x8x8xf32>
    %233 = vector.shape_cast %232 : vector<1x8x8xf32> to vector<8x8xf32>
    %234 = tpu.concatenate %227, %229, %231, %233 in 1 : vector<8x8xf32>, vector<8x8xf32>, vector<8x8xf32>, vector<8x8xf32> -> vector<8x32xf32>
    %235 = vector.extract_strided_slice %225 {offsets = [4, 0, 0], sizes = [1, 8, 8], strides = [1, 1, 1]} : vector<8x8x8xf32> to vector<1x8x8xf32>
    %236 = vector.shape_cast %235 : vector<1x8x8xf32> to vector<8x8xf32>
    %237 = vector.extract_strided_slice %225 {offsets = [5, 0, 0], sizes = [1, 8, 8], strides = [1, 1, 1]} : vector<8x8x8xf32> to vector<1x8x8xf32>
    %238 = vector.shape_cast %237 : vector<1x8x8xf32> to vector<8x8xf32>
    %239 = vector.extract_strided_slice %225 {offsets = [6, 0, 0], sizes = [1, 8, 8], strides = [1, 1, 1]} : vector<8x8x8xf32> to vector<1x8x8xf32>
    %240 = vector.shape_cast %239 : vector<1x8x8xf32> to vector<8x8xf32>
    %241 = vector.extract_strided_slice %225 {offsets = [7, 0, 0], sizes = [1, 8, 8], strides = [1, 1, 1]} : vector<8x8x8xf32> to vector<1x8x8xf32>
    %242 = vector.shape_cast %241 : vector<1x8x8xf32> to vector<8x8xf32>
    %243 = tpu.concatenate %236, %238, %240, %242 in 1 : vector<8x8xf32>, vector<8x8xf32>, vector<8x8xf32>, vector<8x8xf32> -> vector<8x32xf32>
    %244 = tpu.concatenate %234, %243 in 0 : vector<8x32xf32>, vector<8x32xf32> -> vector<16x32xf32>
    %cst_33 = arith.constant dense<0.000000e+00> : vector<16x32xf32>
    %245 = tpu.matmul %244, %2, %cst_33 {dimension_numbers = #tpu.dot_dimension_numbers<[1], [0], [0], [1], [0, 0, 1, 1], [], []>} : vector<16x32xf32>, vector<32x32xf32>, vector<16x32xf32> -> vector<16x32xf32>
    %246 = vector.broadcast %7 : vector<1x32xf32> to vector<16x32xf32>
    %247 = arith.addf %245, %246 : vector<16x32xf32>
    %248 = arith.addf %158, %247 : vector<16x32xf32>
    %cst_34 = arith.constant dense<0.000000e+00> : vector<16xf32>
    %249 = vector.multi_reduction <add>, %248, %cst_34 [1] : vector<16x32xf32> to vector<16xf32>
    %250 = vector.shape_cast %249 : vector<16xf32> to vector<16x1xf32>
    %cst_35 = arith.constant 3.200000e+01 : f32
    %251 = vector.broadcast %cst_35 : f32 to vector<16x1xf32>
    %252 = arith.divf %250, %251 : vector<16x1xf32>
    %253 = arith.mulf %248, %248 : vector<16x32xf32>
    %cst_36 = arith.constant dense<0.000000e+00> : vector<16xf32>
    %254 = vector.multi_reduction <add>, %253, %cst_36 [1] : vector<16x32xf32> to vector<16xf32>
    %255 = vector.shape_cast %254 : vector<16xf32> to vector<16x1xf32>
    %cst_37 = arith.constant 3.200000e+01 : f32
    %256 = vector.broadcast %cst_37 : f32 to vector<16x1xf32>
    %257 = arith.divf %255, %256 : vector<16x1xf32>
    %258 = arith.mulf %252, %252 : vector<16x1xf32>
    %259 = arith.subf %257, %258 : vector<16x1xf32>
    %260 = vector.broadcast %252 : vector<16x1xf32> to vector<16x32xf32>
    %261 = arith.subf %248, %260 : vector<16x32xf32>
    %cst_38 = arith.constant 9.99999974E-6 : f32
    %262 = vector.broadcast %cst_38 : f32 to vector<16x1xf32>
    %263 = arith.addf %259, %262 : vector<16x1xf32>
    %264 = math.rsqrt %263 : vector<16x1xf32>
    %265 = vector.broadcast %264 : vector<16x1xf32> to vector<16x32xf32>
    %266 = arith.mulf %261, %265 : vector<16x32xf32>
    %267 = vector.broadcast %10 : vector<1x32xf32> to vector<16x32xf32>
    %268 = arith.mulf %266, %267 : vector<16x32xf32>
    %269 = vector.broadcast %11 : vector<1x32xf32> to vector<16x32xf32>
    %270 = arith.addf %268, %269 : vector<16x32xf32>
    %cst_39 = arith.constant dense<0.000000e+00> : vector<16x64xf32>
    %271 = tpu.matmul %270, %3, %cst_39 {dimension_numbers = #tpu.dot_dimension_numbers<[1], [0], [0], [1], [0, 0, 1, 1], [], []>} : vector<16x32xf32>, vector<32x64xf32>, vector<16x64xf32> -> vector<16x64xf32>
    %272 = vector.broadcast %8 : vector<1x64xf32> to vector<16x64xf32>
    %273 = arith.addf %271, %272 : vector<16x64xf32>
    %cst_40 = arith.constant 0.000000e+00 : f32
    %274 = vector.broadcast %cst_40 : f32 to vector<16x64xf32>
    %275 = arith.maximumf %273, %274 : vector<16x64xf32>
    %cst_41 = arith.constant dense<0.000000e+00> : vector<16x32xf32>
    %276 = tpu.matmul %275, %4, %cst_41 {dimension_numbers = #tpu.dot_dimension_numbers<[1], [0], [0], [1], [0, 0, 1, 1], [], []>} : vector<16x64xf32>, vector<64x32xf32>, vector<16x32xf32> -> vector<16x32xf32>
    %277 = vector.broadcast %9 : vector<1x32xf32> to vector<16x32xf32>
    %278 = arith.addf %276, %277 : vector<16x32xf32>
    %279 = arith.addf %270, %278 : vector<16x32xf32>
    %cst_42 = arith.constant dense<0.000000e+00> : vector<16xf32>
    %280 = vector.multi_reduction <add>, %279, %cst_42 [1] : vector<16x32xf32> to vector<16xf32>
    %281 = vector.shape_cast %280 : vector<16xf32> to vector<16x1xf32>
    %cst_43 = arith.constant 3.200000e+01 : f32
    %282 = vector.broadcast %cst_43 : f32 to vector<16x1xf32>
    %283 = arith.divf %281, %282 : vector<16x1xf32>
    %284 = arith.mulf %279, %279 : vector<16x32xf32>
    %cst_44 = arith.constant dense<0.000000e+00> : vector<16xf32>
    %285 = vector.multi_reduction <add>, %284, %cst_44 [1] : vector<16x32xf32> to vector<16xf32>
    %286 = vector.shape_cast %285 : vector<16xf32> to vector<16x1xf32>
    %cst_45 = arith.constant 3.200000e+01 : f32
    %287 = vector.broadcast %cst_45 : f32 to vector<16x1xf32>
    %288 = arith.divf %286, %287 : vector<16x1xf32>
    %289 = arith.mulf %283, %283 : vector<16x1xf32>
    %290 = arith.subf %288, %289 : vector<16x1xf32>
    %291 = vector.broadcast %283 : vector<16x1xf32> to vector<16x32xf32>
    %292 = arith.subf %279, %291 : vector<16x32xf32>
    %cst_46 = arith.constant 9.99999974E-6 : f32
    %293 = vector.broadcast %cst_46 : f32 to vector<16x1xf32>
    %294 = arith.addf %290, %293 : vector<16x1xf32>
    %295 = math.rsqrt %294 : vector<16x1xf32>
    %296 = vector.broadcast %295 : vector<16x1xf32> to vector<16x32xf32>
    %297 = arith.mulf %292, %296 : vector<16x32xf32>
    %298 = vector.broadcast %12 : vector<1x32xf32> to vector<16x32xf32>
    %299 = arith.mulf %297, %298 : vector<16x32xf32>
    %300 = vector.broadcast %13 : vector<1x32xf32> to vector<16x32xf32>
    %301 = arith.addf %299, %300 : vector<16x32xf32>
    %302 = vector.shape_cast %301 : vector<16x32xf32> to vector<2x8x32xf32>
    %c0_47 = arith.constant 0 : index
    %c0_48 = arith.constant 0 : index
    %c0_49 = arith.constant 0 : index
    %303 = vector.load %arg5[%c0_47, %c0_48, %c0_49] : memref<2x8x32xf32, #tpu.memory_space<vmem>>, vector<2x8x32xf32>
    tpu.vector_store %arg5[%c0_47, %c0_48, %c0_49], %302 {strides = array<i32>} : memref<2x8x32xf32, #tpu.memory_space<vmem>>, vector<2x8x32xf32>,
    return
  }
  func.func @transform_0(%arg0: i32) -> (i32, i32, i32) {
    %c0_i32 = arith.constant 0 : i32
    %c0_i32_0 = arith.constant 0 : i32
    %c0_i32_1 = arith.constant 0 : i32
    %c0_i32_2 = arith.constant 0 : i32
    return %c0_i32, %c0_i32_0, %c0_i32_1 : i32, i32, i32
  }
  func.func @transform_1(%arg0: i32) -> (i32, i32) {
    %c0_i32 = arith.constant 0 : i32
    %c0_i32_0 = arith.constant 0 : i32
    %c0_i32_1 = arith.constant 0 : i32
    return %c0_i32, %c0_i32_0 : i32, i32
  }
  func.func @transform_2(%arg0: i32) -> (i32, i32) {
    %c0_i32 = arith.constant 0 : i32
    %c0_i32_0 = arith.constant 0 : i32
    %c0_i32_1 = arith.constant 0 : i32
    return %c0_i32, %c0_i32_0 : i32, i32
  }
  func.func @transform_3(%arg0: i32) -> (i32, i32) {
    %c0_i32 = arith.constant 0 : i32
    %c0_i32_0 = arith.constant 0 : i32
    %c0_i32_1 = arith.constant 0 : i32
    return %c0_i32, %c0_i32_0 : i32, i32
  }
  func.func @transform_4(%arg0: i32) -> (i32, i32, i32) {
    %c0_i32 = arith.constant 0 : i32
    %c0_i32_0 = arith.constant 0 : i32
    %c0_i32_1 = arith.constant 0 : i32
    %c0_i32_2 = arith.constant 0 : i32
    return %c0_i32, %c0_i32_0, %c0_i32_1 : i32, i32, i32
  }
}

</mosaic_0001>

<bundles_post_ra>
// kernel: transformer_encoder.1
= control target key start
LH: loop header
LB: loop body
LE: loop exit
PB: predicated region body
PF: predicated region fallthrough
CT: control target
= control target key end

     0   :  { %s2809_s0 = inlined_call_operand.vmem [shape: f32[2,8,32], index: 0, kind: input, shape index: {}]   ;;  %s2810_s1 = inlined_call_operand.vmem [shape: f32[32,192], index: 1, kind: input, shape index: {}]   ;;  %s2811_s2 = inlined_call_operand.vmem [shape: f32[64,32], index: 2, kind: input, shape index: {}]   ;;  %s2812_s3 = inlined_call_operand.vmem [shape: f32[8,128], index: 3, kind: input, shape index: {}]   ;;  %s2813_s4 = inlined_call_operand.hbm [shape: f32[2,8,32], index: 4, kind: output, shape index: {}]  }
   0x1   :  { %v2130_v0 = vld [vmem:[%s2810_s1 + $0x30] sm:$0xff]  ;;  %v2135_v1 = vld [vmem:[%s2810_s1 + $0x20] sm:$0xff] }
   0x2   :  { %57 = vmatpush.msra.mxu0 %v2130_v0  ;;  %v2141_v2 = vld [vmem:[%s2810_s1 + $0x10] sm:$0xff] }
   0x3   :  { %9 = vsyncpa [#allocation3], 0  ;;  %v2147_v3 = vld [vmem:[%s2810_s1] sm:$0xff]  ;;  %vm38_vm0 = vcmask 261120   ;;  %v2161_v5 = vld [vmem:[%s2809_s0 + $0x8] sm:$0xff]  ;;  %s2090_s29 = smov 104  }
   0x4   :  { %58 = vmatpush.msra.mxu0 %v2135_v1  ;;  %v2153_v4 = vld [vmem:[%s2809_s0] sm:$0xff]  ;;  %s2091_s0 = smov 120   ;;  %s2092_s30 = smov 112   ;;  %vm84_vm1 = vcmask 64512  }
   0x5   :  { %v2168_v6 = vld [vmem:[%s2812_s3] sm:$0xff]  ;;  %s2093_s5 = smov 96   ;;  %s2094_s6 = smov 64  }
   0x6   :  { %59 = vmatpush.msra.mxu0 %v2141_v2  ;;  %v2171_v7 = vperm.slane %v2168_v6, 0  ;;  %s2095_s7 = smov 32   ;;  %s2096_s8 = smov 8  }
   0x7   :  { %s2097_s9 = smov 24   ;;  %s2098_s10 = smov 16  }
   0x8   :  { %60 = vmatpush.msra.mxu0 %v2147_v3 }
   0x9   :  { %1865 = vmatmul.msk.f32.vlgmr.msra.gmra.mxu0 %vm38_vm0, %v2153_v4 }
  0x11   :  { %1866 = vmatmul.msk.f32.gmra.mxu0 %vm38_vm0, %v2161_v5 }
  0x86   :  { %v62_v8 = vpop.f32.mrf.mxu0 }
  0x87   :  { %v2174_v9 = vadd.f32 %v62_v8, %v2171_v7 }
  0x89   :  { %73 = vrot.lane.b32.xlu1 %v2174_v9, %s2090_s29  ;;  %69 = vrot.lane.b32.xlu0 %v2174_v9, %s2091_s0 }
  0x8e   :  { %v65_v10 = vpop.f32.mrf.mxu0 }
  0x8f   :  { %v2181_v11 = vadd.f32 %v65_v10, %v2171_v7 }
  0x91   :  { %76 = vrot.lane.b32.xlu2 %v2181_v11, %s2091_s0  ;;  %80 = vrot.lane.b32.xlu1 %v2181_v11, %s2090_s29 }
  0x92   :  { %71 = vrot.lane.b32.xlu0 %v2174_v9, %s2092_s30 }
  0x99   :  { %78 = vrot.lane.b32.xlu2 %v2181_v11, %s2092_s30  ;;  %82 = vrot.lane.b32.xlu1 %v2174_v9, %s2093_s5 }
  0xa1   :  { %187 = vrot.lane.b32.xlu2 %v2181_v11, %s2093_s5 }
  0xeb   :  { %v2195_v12 = vpop.permute.xlu2 %76 }
  0xf3   :  { %v2197_v13 = vpop.permute.xlu2 %78 }
  0xfb   :  { %v188_v14 = vpop.permute.xlu2 %187  ;;  %v2199_v15 = vpop.permute.xlu1 %73 }
  0xfc   :  { %v2201_v16 = vpop.permute.xlu0 %69  ;;  %1875 = vmatpush.xpose.msk.msra.mxu2 %vm84_vm1, %v188_v14  ;;  %161 = vrot.lane.b32.xlu1 %v2199_v15, %s2093_s5 }
  0xfd   :  { %109 = vrot.lane.b32.xlu0 %v2201_v16, %s2093_s5 }
  0xff   :  { %1876 = vmatmul.msk.f32.vlgmr.msra.gmra.mxu2 %vm84_vm1, %v2181_v11 }
 0x103   :  { %v2210_v17 = vpop.permute.xlu1 %80 }
 0x104   :  { %v2212_v18 = vpop.permute.xlu0 %71  ;;  %239 = vrot.lane.b32.xlu1 %v2197_v13, %s2093_s5  ;;  %265 = vrot.lane.b32.xlu2 %v2210_v17, %s2093_s5 }
 0x105   :  { %135 = vrot.lane.b32.xlu0 %v2212_v18, %s2093_s5 }
 0x10b   :  { %v83_v19 = vpop.permute.xlu1 %82 }
 0x10c   :  { %1867 = vmatpush.xpose.msk.msra.mxu1 %vm84_vm1, %v83_v19 }
 0x10d   :  { %213 = vrot.lane.b32.xlu0 %v2195_v12, %s2093_s5 }
 0x10f   :  { %1868 = vmatmul.msk.f32.vlgmr.msra.gmra.mxu1 %vm84_vm1, %v2174_v9 }
 0x15e   :  { %v266_v20 = vpop.permute.xlu2 %265 }
 0x15f   :  { %1881 = vmatpush.xpose.msk.msrb.mxu2 %vm84_vm1, %v266_v20 }
 0x162   :  { %1882 = vmatmul.msk.f32.vlgmr.msrb.gmra.mxu2 %vm84_vm1, %v2210_v17 }
 0x16e   :  { %v162_v21 = vpop.permute.xlu1 %161 }
 0x16f   :  { %v110_v22 = vpop.permute.xlu0 %109  ;;  %1873 = vmatpush.xpose.msk.msrb.mxu1 %vm84_vm1, %v162_v21 }
 0x170   :  { %1869 = vmatpush.xpose.msk.msra.mxu3 %vm84_vm1, %v110_v22 }
 0x172   :  { %1874 = vmatmul.msk.f32.vlgmr.msrb.gmra.mxu1 %vm84_vm1, %v2199_v15 }
 0x173   :  { %1870 = vmatmul.msk.f32.vlgmr.msra.gmra.mxu3 %vm84_vm1, %v2201_v16 }
 0x176   :  { %v240_v23 = vpop.permute.xlu1 %239 }
 0x177   :  { %v136_v24 = vpop.permute.xlu0 %135  ;;  %1879 = vmatpush.xpose.msk.msra.mxu1 %vm84_vm1, %v240_v23 }
 0x178   :  { %1871 = vmatpush.xpose.msk.msrb.mxu3 %vm84_vm1, %v136_v24 }
 0x17a   :  { %1880 = vmatmul.msk.f32.vlgmr.msra.gmra.mxu1 %vm84_vm1, %v2197_v13 }
 0x17b   :  { %1872 = vmatmul.msk.f32.vlgmr.msrb.gmra.mxu3 %vm84_vm1, %v2212_v18 }
 0x17f   :  { %v214_v25 = vpop.permute.xlu0 %213 }
 0x180   :  { %1877 = vmatpush.xpose.msk.msra.mxu3 %vm84_vm1, %v214_v25 }
 0x182   :  { %v210_v27 = vpop.f32.mrf.mxu2 }
 0x183   :  { %1878 = vmatmul.msk.f32.vlgmr.msra.gmra.mxu3 %vm84_vm1, %v2195_v12  ;;  %v2250_v48 = vmul.f32 0.35355338, %v210_v27 }
 0x185   :  { %v311_v49 = vsel %vm84_vm1, %v2250_v48, -inf }
 0x18c   :  { %v106_v26 = vpop.f32.mrf.mxu1 }
 0x18d   :  { %v291_v43 = vmul.f32 0.35355338, %v106_v26 }
 0x18f   :  { %v299_v46 = vsel %vm84_vm1, %v291_v43, -inf }
 0x1e5   :  { %v288_v31 = vpop.f32.mrf.mxu2 }
 0x1e6   :  { %v298_v32 = vmul.f32 0.35355338, %v288_v31 }
 0x1e8   :  { %v320_v37 = vsel %vm84_vm1, %v298_v32, -inf }
 0x1ef   :  { %v184_v28 = vpop.f32.mrf.mxu1 }
 0x1f0   :  { %v294_v29 = vmul.f32 0.35355338, %v184_v28 }
 0x1f2   :  { %v308_v30 = vsel %vm84_vm1, %v294_v29, -inf }
 0x1f3   :  { %309 = vmax.xlane.f32.xlu2 %v308_v30 }
 0x1f6   :  { %v132_v33 = vpop.f32.mrf.mxu3 }
 0x1f7   :  { %v292_v34 = vmul.f32 0.35355338, %v132_v33  ;;  %v262_v36 = vpop.f32.mrf.mxu1  ;;  %v1951_v33 = vpack.i.bf16 %v2197_v13, %v2195_v12 }
 0x1f8   :  { %v297_v38 = vmul.f32 0.35355338, %v262_v36 }
 0x1f9   :  { %v302_v35 = vsel %vm84_vm1, %v292_v34, -inf }
 0x1fa   :  { %303 = vmax.xlane.f32.xlu0 %v302_v35  ;;  %v317_v41 = vsel %vm84_vm1, %v297_v38, -inf }
 0x1fb   :  { %321 = vmax.xlane.f32.xlu2 %v320_v37 }
 0x1fe   :  { %v158_v39 = vpop.f32.mrf.mxu3 }
 0x1ff   :  { %v293_v40 = vmul.f32 0.35355338, %v158_v39 }
 0x201   :  { %v305_v42 = vsel %vm84_vm1, %v293_v40, -inf }
 0x202   :  { %318 = vmax.xlane.f32.xlu0 %v317_v41  ;;  %306 = vmax.xlane.f32.xlu1 %v305_v42 }
 0x206   :  { %v236_v44 = vpop.f32.mrf.mxu3 }
 0x207   :  { %v296_v45 = vmul.f32 0.35355338, %v236_v44 }
 0x209   :  { %v314_v47 = vsel %vm84_vm1, %v296_v45, -inf }
 0x20a   :  { %300 = vmax.xlane.f32.xlu1 %v299_v46  ;;  %315 = vmax.xlane.f32.xlu2 %v314_v47 }
 0x212   :  { %312 = vmax.xlane.f32.xlu2 %v311_v49 }
 0x266   :  { %v310_v50 = vpop.xlane.xlu2 %309 }
 0x267   :  { %v326_v51 = vsub.f32 %v294_v29, %v310_v50 }
 0x269   :  { %v337_v52 = vmul.f32 1.442695, %v326_v51 }
 0x26b   :  { %1981 = vpow2.f32 %v337_v52 }
 0x26d   :  { %v304_v53 = vpop.xlane.xlu0 %303 }
 0x26e   :  { %v324_v54 = vsub.f32 %v292_v34, %v304_v53  ;;  %v322_v55 = vpop.xlane.xlu2 %321  ;;  %v1946_v34 = vpack.i.bf16 %v2210_v17, %v2212_v18 }
 0x26f   :  { %v330_v56 = vsub.f32 %v298_v32, %v322_v55  ;;  %v1941_v32 = vpack.i.bf16 %v2201_v16, %v2199_v15 }
 0x270   :  { %v333_v57 = vmul.f32 1.442695, %v324_v54 }
 0x271   :  { %v2254_v58 = vpop.eup %1981  ;;  %v345_v59 = vmul.f32 1.442695, %v330_v56 }
 0x272   :  { %1983 = vpow2.f32 %v333_v57  ;;  %v356_v60 = vsel %vm84_vm1, %v2254_v58, 0.0 }
 0x273   :  { %1985 = vpow2.f32 %v345_v59  ;;  %357 = vadd.xlane.f32.xlu0 %v356_v60 }
 0x275   :  { %v319_v61 = vpop.xlane.xlu0 %318  ;;  %v307_v62 = vpop.xlane.xlu1 %306 }
 0x276   :  { %v329_v63 = vsub.f32 %v297_v38, %v319_v61  ;;  %v325_v19 = vsub.f32 %v293_v40, %v307_v62 }
 0x278   :  { %v2258_v8 = vpop.eup %1983  ;;  %v343_v10 = vmul.f32 1.442695, %v329_v63  ;;  %v335_v22 = vmul.f32 1.442695, %v325_v19 }
 0x279   :  { %v2260_v14 = vpop.eup %1985  ;;  %v350_v20 = vsel %vm84_vm1, %v2258_v8, 0.0 }
 0x27a   :  { %351 = vadd.xlane.f32.xlu1 %v350_v20  ;;  %v368_v21 = vsel %vm84_vm1, %v2260_v14, 0.0  ;;  %1987 = vpow2.f32 %v343_v10 }
 0x27b   :  { %369 = vadd.xlane.f32.xlu0 %v368_v21  ;;  %1989 = vpow2.f32 %v335_v22 }
 0x27d   :  { %v316_v23 = vpop.xlane.xlu2 %315  ;;  %v301_v35 = vpop.xlane.xlu1 %300 }
 0x27e   :  { %v328_v24 = vsub.f32 %v296_v45, %v316_v23  ;;  %v323_v36 = vsub.f32 %v291_v43, %v301_v35 }
 0x280   :  { %v341_v25 = vmul.f32 1.442695, %v328_v24  ;;  %v2266_v26 = vpop.eup %1987  ;;  %v331_v37 = vmul.f32 1.442695, %v323_v36 }
 0x281   :  { %v365_v27 = vsel %vm84_vm1, %v2266_v26, 0.0  ;;  %v2270_v28 = vpop.eup %1989 }
 0x282   :  { %1991 = vpow2.f32 %v341_v25  ;;  %366 = vadd.xlane.f32.xlu2 %v365_v27  ;;  %v353_v31 = vsel %vm84_vm1, %v2270_v28, 0.0 }
 0x283   :  { %1993 = vpow2.f32 %v331_v37 }
 0x285   :  { %v313_v13 = vpop.xlane.xlu2 %312 }
 0x286   :  { %v327_v16 = vsub.f32 %v2250_v48, %v313_v13 }
 0x288   :  { %v2272_v29 = vpop.eup %1991  ;;  %v339_v17 = vmul.f32 1.442695, %v327_v16 }
 0x289   :  { %v362_v30 = vsel %vm84_vm1, %v2272_v29, 0.0  ;;  %v2291_v15 = vpop.eup %1993 }
 0x28a   :  { %363 = vadd.xlane.f32.xlu1 %v362_v30  ;;  %354 = vadd.xlane.f32.xlu2 %v353_v31  ;;  %v347_v12 = vsel %vm84_vm1, %v2291_v15, 0.0  ;;  %1995 = vpow2.f32 %v339_v17 }
 0x28f   :  { %1942 = vrot.lane.b32.xlu0 %v1941_v32, %s2094_s6 }
 0x290   :  { %v2296_v18 = vpop.eup %1995 }
 0x2a2   :  { %1952 = vrot.lane.b32.xlu2 %v1951_v33, %s2094_s6 }
 0x2a3   :  { %1947 = vrot.lane.b32.xlu1 %v1946_v34, %s2094_s6 }
 0x2aa   :  { %491 = vrot.lane.b32.xlu2 %v2174_v9, %s2094_s6  ;;  %v359_v9 = vsel %vm84_vm1, %v2296_v18, 0.0 }
 0x2b2   :  { %595 = vrot.lane.b32.xlu2 %v2181_v11, %s2094_s6 }
 0x2b9   :  { %348 = vadd.xlane.f32.xlu0 %v347_v12 }
 0x2cd   :  { %360 = vadd.xlane.f32.xlu1 %v359_v9 }
 0x2e6   :  { %v358_v38 = vpop.xlane.xlu0 %357 }
 0x2e7   :  { %1997 = vrcp.f32 %v358_v38  ;;  %vm421_vm4 = vweird.f32 %v358_v38  ;;  %v427_v50 = vand.u32 2147483648, %v358_v38  ;;  %v425_v53 = vand.u32 2147483647, %v358_v38 }
 0x2e9   :  { %v428_v60 = vor.u32 1.1754944e-38, %v427_v50  ;;  %vm426_vm8 = vcmp.eq.f32.partialorder %v425_v53, 8.507059e+37 }
 0x2ed   :  { %v1998_v11 = vpop.eup %1997  ;;  %v352_v39 = vpop.xlane.xlu1 %351 }
 0x2ee   :  { %v417_v40 = vmul.f32 %v1998_v11, %v358_v38  ;;  %1999 = vrcp.f32 %v352_v39  ;;  %v2300_v45 = vpop.xlane.xlu0 %369  ;;  %vm422_vm2 = vweird.f32 %v1998_v11  ;;  %v397_v51 = vand.u32 2147483648, %v352_v39 }
 0x2ef   :  { %2001 = vrcp.f32 %v2300_v45  ;;  %vm2305_vm5 = vmor %vm421_vm4, %vm422_vm2  ;;  %vm391_vm6 = vweird.f32 %v352_v39  ;;  %v395_v55 = vand.u32 2147483647, %v352_v39  ;;  %vm481_vm2 = vweird.f32 %v2300_v45 }
 0x2f0   :  { %v418_v41 = vsub.f32 1.0, %v417_v40  ;;  %v398_v61 = vor.u32 1.1754944e-38, %v397_v51 }
 0x2f1   :  { %vm396_vm9 = vcmp.eq.f32.partialorder %v395_v55, 8.507059e+37 }
 0x2f2   :  { %v419_v43 = vmul.f32 %v1998_v11, %v418_v41 }
 0x2f4   :  { %v2000_v42 = vpop.eup %1999  ;;  %v420_v48 = vadd.f32 %v1998_v11, %v419_v43 }
 0x2f5   :  { %v387_v44 = vmul.f32 %v2000_v42, %v352_v39  ;;  %v2302_v46 = vpop.xlane.xlu2 %366  ;;  %vm392_vm3 = vweird.f32 %v2000_v42  ;;  %v2311_v59 = vpop.eup %2001 }
 0x2f6   :  { %vm393_vm7 = vmor %vm391_vm6, %vm392_vm3  ;;  %v424_v56 = vsel %vm2305_vm5, %v1998_v11, %v420_v48  ;;  %2003 = vrcp.f32 %v2302_v46  ;;  %v477_v20 = vmul.f32 %v2311_v59, %v2300_v45  ;;  %vm482_vm12 = vweird.f32 %v2311_v59 }
 0x2f7   :  { %v388_v47 = vsub.f32 1.0, %v387_v44  ;;  %v429_v10 = vsel %vm426_vm8, %v428_v60, %v424_v56  ;;  %v487_v44 = vand.u32 2147483648, %v2300_v45  ;;  %vm483_vm3 = vmor %vm481_vm2, %vm482_vm12 }
 0x2f8   :  { %v430_v25 = vmul.f32 %v2254_v58, %v429_v10  ;;  %v478_v31 = vsub.f32 1.0, %v477_v20  ;;  %v470_v10 = vand.u32 2147483647, %v2302_v46 }
 0x2f9   :  { %v389_v49 = vmul.f32 %v2000_v42, %v388_v47  ;;  %v488_v55 = vor.u32 1.1754944e-38, %v487_v44 }
 0x2fa   :  { %v479_v58 = vmul.f32 %v2311_v59, %v478_v31 }
 0x2fb   :  { %v390_v54 = vadd.f32 %v2000_v42, %v389_v49  ;;  %v485_v49 = vand.u32 2147483647, %v2300_v45 }
 0x2fc   :  { %v2321_v27 = vpop.eup %2003  ;;  %v480_v11 = vadd.f32 %v2311_v59, %v479_v58 }
 0x2fd   :  { %v394_v57 = vsel %vm393_vm7, %v2000_v42, %v390_v54  ;;  %v364_v62 = vpop.xlane.xlu1 %363  ;;  %v2314_v63 = vpop.xlane.xlu2 %354  ;;  %v462_v37 = vmul.f32 %v2321_v27, %v2302_v46  ;;  %vm486_vm6 = vcmp.eq.f32.partialorder %v485_v49, 8.507059e+37  ;;  %vm467_vm8 = vweird.f32 %v2321_v27 }
 0x2fe   :  { %2005 = vrcp.f32 %v364_v62  ;;  %v399_v19 = vsel %vm396_vm9, %v398_v61, %v394_v57  ;;  %v457_v12 = vand.u32 2147483648, %v364_v62  ;;  %v455_v17 = vand.u32 2147483647, %v364_v62 }
 0x2ff   :  { %2007 = vrcp.f32 %v2314_v63  ;;  %v400_v24 = vmul.f32 %v2258_v8, %v399_v19  ;;  %vm451_vm11 = vweird.f32 %v364_v62  ;;  %v463_v39 = vsub.f32 1.0, %v462_v37 }
 0x300   :  { %v458_v40 = vor.u32 1.1754944e-38, %v457_v12  ;;  %vm456_vm14 = vcmp.eq.f32.partialorder %v455_v17, 8.507059e+37  ;;  %v412_v48 = vand.u32 2147483648, %v2314_v63  ;;  %vm406_vm4 = vweird.f32 %v2314_v63 }
 0x301   :  { %v1943_v21 = vpop.permute.xlu0 %1942  ;;  %v410_v50 = vand.u32 2147483647, %v2314_v63  ;;  %v484_v52 = vsel %vm483_vm3, %v2311_v59, %v480_v11  ;;  %v464_v53 = vmul.f32 %v2321_v27, %v463_v39  ;;  %vm466_vm9 = vweird.f32 %v2302_v46 }
 0x302   :  { %v1944_v22 = vunpack.i.l.bf16 %v1943_v21  ;;  %v1945_v23 = vunpack.i.h.bf16 %v1943_v21  ;;  %v413_v56 = vor.u32 1.1754944e-38, %v412_v48  ;;  %v489_v57 = vsel %vm486_vm6, %v488_v55, %v484_v52 }
 0x303   :  { %vm411_vm7 = vcmp.eq.f32.partialorder %v410_v50, 8.507059e+37  ;;  %v465_v60 = vadd.f32 %v2321_v27, %v464_v53  ;;  %v490_v20 = vmul.f32 %v2260_v14, %v489_v57  ;;  %v1961_v39 = vpack.i.bf16 %v2147_v3, %v2141_v2 }
 0x304   :  { %538 = vmatpush.msrb.mxu0 %v1945_v23  ;;  %590 = vmatpush.msra.mxu2 %v1944_v22  ;;  %v2006_v30 = vpop.eup %2005  ;;  %vm712_vm6 = vcmask 130048  }
 0x305   :  { %1884 = vmatmul.msk.f32.vlgmr.msrb.gmra.mxu0 %vm84_vm1, %v400_v24  ;;  %1886 = vmatmul.msk.f32.vlgmr.msra.gmra.mxu2 %vm84_vm1, %v430_v25  ;;  %v2008_v32 = vpop.eup %2007  ;;  %v447_v33 = vmul.f32 %v2006_v30, %v364_v62  ;;  %v2325_v34 = vpop.permute.xlu2 %1952  ;;  %vm452_vm10 = vweird.f32 %v2006_v30  ;;  %v472_v62 = vand.u32 2147483648, %v2302_v46 }
 0x306   :  { %v402_v35 = vmul.f32 %v2008_v32, %v2314_v63  ;;  %v1954_v8 = vunpack.i.l.bf16 %v2325_v34  ;;  %vm453_vm13 = vmor %vm451_vm11, %vm452_vm10  ;;  %vm407_vm15 = vweird.f32 %v2008_v32  ;;  %v1955_v21 = vunpack.i.h.bf16 %v2325_v34  ;;  %1962 = vrot.lane.b32.xlu0 %v1961_v39, %s2095_s7 }
 0x307   :  { %v448_v36 = vsub.f32 1.0, %v447_v33  ;;  %vm408_vm5 = vmor %vm406_vm4, %vm407_vm15  ;;  %v473_v23 = vor.u32 1.1754944e-38, %v472_v62  ;;  %vm471_vm11 = vcmp.eq.f32.partialorder %v470_v10, 8.507059e+37  ;;  %v2402_v10 = vperm.slane %v2168_v6, 1 }
 0x308   :  { %v403_v13 = vsub.f32 1.0, %v402_v35  ;;  %642 = vmatpush.msra.mxu0 %v1954_v8  ;;  %vm468_vm10 = vmor %vm466_vm9, %vm467_vm8 }
 0x309   :  { %v449_v16 = vmul.f32 %v2006_v30, %v448_v36  ;;  %v469_v22 = vsel %vm468_vm10, %v2321_v27, %v465_v60  ;;  %v1956_v27 = vpack.i.bf16 %v2135_v1, %v2130_v0 }
 0x30a   :  { %v404_v9 = vmul.f32 %v2008_v32, %v403_v13  ;;  %v474_v46 = vsel %vm471_vm11, %v473_v23, %v469_v22 }
 0x30b   :  { %v450_v38 = vadd.f32 %v2006_v30, %v449_v16  ;;  %v475_v14 = vmul.f32 %v2266_v26, %v474_v46  ;;  %1957 = vrot.lane.b32.xlu2 %v1956_v27, %s2095_s7 }
 0x30c   :  { %v405_v42 = vadd.f32 %v2008_v32, %v404_v9 }
 0x30d   :  { %v454_v41 = vsel %vm453_vm13, %v2006_v30, %v450_v38  ;;  %v492_v43 = vpop.permute.xlu2 %491 }
 0x30e   :  { %v459_v47 = vsel %vm456_vm14, %v458_v40, %v454_v41  ;;  %512 = vmatpush.msrb.mxu3 %v492_v43  ;;  %v409_v54 = vsel %vm408_vm5, %v2008_v32, %v405_v42 }
 0x30f   :  { %v460_v51 = vmul.f32 %v2272_v29, %v459_v47  ;;  %v414_v45 = vsel %vm411_vm7, %v413_v56, %v409_v54  ;;  %vm714_vm7 = vcmask 195584  }
 0x310   :  { %v415_v19 = vmul.f32 %v2270_v28, %v414_v45 }
 0x311   :  { %1888 = vmatmul.msk.f32.vlgmr.msra.gmra.mxu0 %vm84_vm1, %v460_v51 }
 0x315   :  { %v1948_v61 = vpop.permute.xlu1 %1947  ;;  %v596_v29 = vpop.permute.xlu2 %595 }
 0x316   :  { %v1950_v59 = vunpack.i.h.bf16 %v1948_v61  ;;  %v1949_v63 = vunpack.i.l.bf16 %v1948_v61  ;;  %616 = vmatpush.msra.mxu3 %v596_v29 }
 0x318   :  { %564 = vmatpush.msrb.mxu1 %v1949_v63  ;;  %694 = vmatpush.msrb.mxu2 %v1950_v59 }
 0x319   :  { %1885 = vmatmul.msk.f32.vlgmr.msrb.gmra.mxu1 %vm84_vm1, %v415_v19  ;;  %1890 = vmatmul.msk.f32.vlgmr.msrb.gmra.mxu2 %vm84_vm1, %v490_v20 }
 0x31a   :  { %668 = vmatpush.msra.mxu1 %v1955_v21  ;;  %977 = vmatpush.msra.mxu2 %v2130_v0 }
 0x31c   :  { %978 = vmatpush.msra.mxu2 %v2135_v1 }
 0x31e   :  { %979 = vmatpush.msra.mxu2 %v2141_v2 }
 0x320   :  { %980 = vmatpush.msra.mxu2 %v2147_v3 }
 0x321   :  { %1889 = vmatmul.msk.f32.vlgmr.msra.gmra.mxu1 %vm84_vm1, %v475_v14 }
 0x32c   :  { %v349_v28 = vpop.xlane.xlu0 %348 }
 0x32d   :  { %2009 = vrcp.f32 %v349_v28  ;;  %v382_v31 = vand.u32 2147483648, %v349_v28  ;;  %v380_v33 = vand.u32 2147483647, %v349_v28  ;;  %vm376_vm13 = vweird.f32 %v349_v28 }
 0x32f   :  { %v383_v34 = vor.u32 1.1754944e-38, %v382_v31  ;;  %vm381_vm15 = vcmp.eq.f32.partialorder %v380_v33, 8.507059e+37 }
 0x333   :  { %v2010_v24 = vpop.eup %2009 }
 0x334   :  { %v372_v25 = vmul.f32 %v2010_v24, %v349_v28  ;;  %vm377_vm12 = vweird.f32 %v2010_v24 }
 0x335   :  { %vm378_vm14 = vmor %vm376_vm13, %vm377_vm12 }
 0x336   :  { %v373_v30 = vsub.f32 1.0, %v372_v25 }
 0x338   :  { %v374_v32 = vmul.f32 %v2010_v24, %v373_v30  ;;  %v2099_v30 = vmov 32.0  }
 0x33a   :  { %v375_v26 = vadd.f32 %v2010_v24, %v374_v32 }
 0x33c   :  { %v379_v35 = vsel %vm378_vm14, %v2010_v24, %v375_v26 }
 0x33d   :  { %v384_v36 = vsel %vm381_vm15, %v383_v34, %v379_v35  ;;  %vm873_vm15 = vcmask 523264  }
 0x33e   :  { %v385_v8 = vmul.f32 %v2291_v15, %v384_v36  ;;  %v2433_v36 = vld [vmem:[%s2810_s1 + $0x28] sm:$0xff] }
 0x340   :  { %1883 = vmatmul.msk.f32.vlgmr.msrb.gmra.mxu3 %vm84_vm1, %v385_v8  ;;  %v361_v0 = vpop.xlane.xlu1 %360 }
 0x341   :  { %2011 = vrcp.f32 %v361_v0  ;;  %v442_v12 = vand.u32 2147483648, %v361_v0  ;;  %v440_v16 = vand.u32 2147483647, %v361_v0  ;;  %vm436_vm3 = vweird.f32 %v361_v0 }
 0x342   :  { %2013 = vrcp.f32 %v2099_v30  ;;  %v2499_v30 = vld [vmem:[%s2811_s2 + $0x10] sm:$0xff] }
 0x343   :  { %v443_v9 = vor.u32 1.1754944e-38, %v442_v12  ;;  %vm441_vm5 = vcmp.eq.f32.partialorder %v440_v16, 8.507059e+37 }
 0x347   :  { %v2012_v1 = vpop.eup %2011 }
 0x348   :  { %v432_v58 = vmul.f32 %v2012_v1, %v361_v0  ;;  %vm437_vm2 = vweird.f32 %v2012_v1  ;;  %v2014_v31 = vpop.eup %2013 }
 0x349   :  { %vm438_vm4 = vmor %vm436_vm3, %vm437_vm2  ;;  %v786_v32 = vmul.f32 32.0, %v2014_v31  ;;  %vm790_vm8 = vweird.f32 %v2014_v31 }
 0x34a   :  { %v433_v37 = vsub.f32 1.0, %v432_v58 }
 0x34b   :  { %v787_v33 = vsub.f32 1.0, %v786_v32  ;;  %v2515_v32 = vperm.slane %v2168_v6, 2 }
 0x34c   :  { %v434_v13 = vmul.f32 %v2012_v1, %v433_v37 }
 0x34d   :  { %v788_v26 = vmul.f32 %v2014_v31, %v787_v33 }
 0x34e   :  { %v435_v17 = vadd.f32 %v2012_v1, %v434_v13  ;;  %v2447_v13 = vld [vmem:[%s2810_s1 + $0x8] sm:$0xff] }
 0x34f   :  { %v789_v34 = vadd.f32 %v2014_v31, %v788_v26 }
 0x350   :  { %v439_v38 = vsel %vm438_vm4, %v2012_v1, %v435_v17  ;;  %v2440_v1 = vld [vmem:[%s2810_s1 + $0x18] sm:$0xff] }
 0x351   :  { %v444_v11 = vsel %vm441_vm5, %v443_v9, %v439_v38  ;;  %v2427_v35 = vsel %vm790_vm8, %v2014_v31, %v789_v34  ;;  %v2504_v31 = vld [vmem:[%s2811_s2 + $0x8] sm:$0xff] }
 0x352   :  { %v445_v15 = vmul.f32 %v2296_v18, %v444_v11 }
 0x354   :  { %1887 = vmatmul.msk.f32.vlgmr.msra.gmra.mxu3 %vm84_vm1, %v445_v15 }
 0x365   :  { %v2376_v2 = vpop.permute.xlu2 %1957 }
 0x366   :  { %v1960_v3 = vunpack.i.h.bf16 %v2376_v2  ;;  %v1959_v44 = vunpack.i.l.bf16 %v2376_v2 }
 0x368   :  { %766 = vmatpush.msrb.mxu3 %v1959_v44 }
 0x36a   :  { %767 = vmatpush.msrb.mxu3 %v1960_v3 }
 0x378   :  { %v2385_v48 = vpop.permute.xlu0 %1962 }
 0x379   :  { %v1965_v49 = vunpack.i.h.bf16 %v2385_v48  ;;  %v1964_v50 = vunpack.i.l.bf16 %v2385_v48 }
 0x37b   :  { %768 = vmatpush.msrb.mxu3 %v1964_v50 }
 0x37d   :  { %769 = vmatpush.msrb.mxu3 %v1965_v49 }
 0x382   :  { %v540_v40 = vpop.f32.mrf.mxu0 }
 0x383   :  { %700 = vrot.lane.b32.xlu2 %v540_v40, %s2096_s8 }
 0x388   :  { %v592_v41 = vpop.f32.mrf.mxu2 }
 0x389   :  { %708 = vrot.lane.b32.xlu1 %v592_v41, %s2097_s9 }
 0x38e   :  { %v644_v43 = vpop.f32.mrf.mxu0 }
 0x396   :  { %v566_v42 = vpop.f32.mrf.mxu1 }
 0x397   :  { %704 = vrot.lane.b32.xlu2 %v566_v42, %s2098_s10  ;;  %v2454_v42 = vld [vmem:[%s2811_s2 + $0x38] sm:$0xff] }
 0x398   :  { %888 = vmatpush.msrb.mxu1 %v2454_v42 }
 0x39c   :  { %v696_v18 = vpop.f32.mrf.mxu2 }
 0x39d   :  { %725 = vrot.lane.b32.xlu0 %v696_v18, %s2097_s9  ;;  %v2459_v18 = vld [vmem:[%s2811_s2 + $0x30] sm:$0xff] }
 0x39e   :  { %v670_v47 = vpop.f32.mrf.mxu1  ;;  %889 = vmatpush.msrb.mxu1 %v2459_v18 }
 0x39f   :  { %717 = vrot.lane.b32.xlu2 %v644_v43, %s2096_s8 }
 0x3a7   :  { %721 = vrot.lane.b32.xlu2 %v670_v47, %s2098_s10 }
 0x3c3   :  { %v514_v53 = vpop.f32.mrf.mxu3 }
 0x3d7   :  { %v618_v61 = vpop.f32.mrf.mxu3 }
 0x3dd   :  { %v701_v51 = vpop.permute.xlu2 %700 }
 0x3de   :  { %v711_v54 = vsel %vm84_vm1, %v514_v53, %v701_v51  ;;  %v2466_v53 = vld [vmem:[%s2811_s2 + $0x28] sm:$0xff] }
 0x3df   :  { %890 = vmatpush.msrb.mxu1 %v2466_v53 }
 0x3f1   :  { %v705_v52 = vpop.permute.xlu2 %704 }
 0x3f2   :  { %v713_v55 = vsel %vm712_vm6, %v711_v54, %v705_v52 }
 0x3f9   :  { %v718_v45 = vpop.permute.xlu2 %717 }
 0x3fa   :  { %v728_v29 = vsel %vm84_vm1, %v618_v61, %v718_v45  ;;  %v2476_v45 = vld [vmem:[%s2811_s2 + $0x20] sm:$0xff]  ;;  %v2479_v61 = vperm.slane %v2168_v6, 5 }
 0x3fb   :  { %v709_v56 = vpop.permute.xlu1 %708  ;;  %891 = vmatpush.msrb.mxu1 %v2476_v45 }
 0x3fc   :  { %v715_v57 = vsel %vm714_vm7, %v713_v55, %v709_v56  ;;  %v2470_v55 = vperm.slane %v2168_v6, 4 }
 0x3fd   :  { %1891 = vmatmul.msk.f32.vlgmr.msrb.gmra.mxu3 %vm38_vm0, %v715_v57 }
 0x401   :  { %v722_v60 = vpop.permute.xlu2 %721 }
 0x402   :  { %v729_v62 = vsel %vm712_vm6, %v728_v29, %v722_v60 }
 0x40f   :  { %v726_v59 = vpop.permute.xlu0 %725 }
 0x410   :  { %v730_v63 = vsel %vm714_vm7, %v729_v62, %v726_v59  ;;  %v2485_v62 = vld [vmem:[%s2811_s2 + $0x18] sm:$0xff] }
 0x411   :  { %1892 = vmatmul.msk.f32.gmra.mxu3 %vm38_vm0, %v730_v63  ;;  %892 = vmatpush.msrb.mxu1 %v2485_v62 }
 0x413   :  { %893 = vmatpush.msrb.mxu1 %v2499_v30 }
 0x415   :  { %894 = vmatpush.msrb.mxu1 %v2504_v31 }
 0x480   :  { %v771_v19 = vpop.f32.mrf.mxu3 }
 0x481   :  { %v772_v20 = vadd.f32 %v771_v19, %v2402_v10 }
 0x483   :  { %v2406_v21 = vadd.f32 %v772_v20, %v2153_v4 }
 0x485   :  { %v779_v22 = vsel %vm38_vm0, %v2406_v21, 0.0  ;;  %v794_v23 = vmul.f32 %v2406_v21, %v2406_v21 }
 0x486   :  { %780 = vadd.xlane.f32.xlu2 %v779_v22 }
 0x487   :  { %v796_v46 = vsel %vm38_vm0, %v794_v23, 0.0 }
 0x488   :  { %797 = vadd.xlane.f32.xlu0 %v796_v46 }
 0x494   :  { %v774_v14 = vpop.f32.mrf.mxu3 }
 0x495   :  { %v775_v28 = vadd.f32 %v774_v14, %v2402_v10 }
 0x497   :  { %v2415_v24 = vadd.f32 %v775_v28, %v2161_v5  ;;  %v2425_v5 = vld [vmem:[%s2810_s1 + $0x38] sm:$0xff] }
 0x498   :  { %859 = vmatpush.msrb.mxu0 %v2425_v5 }
 0x499   :  { %v782_v4 = vsel %vm38_vm0, %v2415_v24, 0.0  ;;  %v795_v25 = vmul.f32 %v2415_v24, %v2415_v24 }
 0x49a   :  { %783 = vadd.xlane.f32.xlu1 %v782_v4  ;;  %860 = vmatpush.msrb.mxu0 %v2433_v36 }
 0x49b   :  { %v799_v27 = vsel %vm38_vm0, %v795_v25, 0.0 }
 0x49c   :  { %800 = vadd.xlane.f32.xlu2 %v799_v27  ;;  %861 = vmatpush.msrb.mxu0 %v2440_v1 }
 0x49e   :  { %862 = vmatpush.msrb.mxu0 %v2447_v13 }
 0x4f9   :  { %v781_v8 = vpop.xlane.xlu2 %780 }
 0x4fa   :  { %v792_v0 = vmul.f32 %v2427_v35, %v781_v8 }
 0x4fb   :  { %v798_v58 = vpop.xlane.xlu0 %797 }
 0x4fc   :  { %v804_v37 = vmul.f32 %v792_v0, %v792_v0  ;;  %v802_v12 = vmul.f32 %v798_v58, %v2427_v35  ;;  %v808_v54 = vsub.f32 %v2406_v21, %v792_v0 }
 0x4fe   :  { %v806_v16 = vsub.f32 %v802_v12, %v804_v37  ;;  %v2522_v37 = vperm.slane %v2168_v6, 3 }
 0x500   :  { %v810_v17 = vadd.f32 1e-05, %v806_v16 }
 0x502   :  { %2015 = vrsqrt.f32 %v810_v17  ;;  %vm818_vm10 = vweird.f32 %v810_v17 }
 0x508   :  { %v2016_v9 = vpop.eup %2015 }
 0x509   :  { %v813_v38 = vmul.f32 %v2016_v9, %v810_v17  ;;  %vm819_vm9 = vweird.f32 %v2016_v9 }
 0x50a   :  { %vm820_vm11 = vmor %vm818_vm10, %vm819_vm9 }
 0x50b   :  { %v814_v11 = vmul.f32 %v2016_v9, %v813_v38 }
 0x50d   :  { %v815_v15 = vmul.f32 0.5, %v814_v11  ;;  %v784_v39 = vpop.xlane.xlu1 %783 }
 0x50e   :  { %v793_v41 = vmul.f32 %v2427_v35, %v784_v39 }
 0x50f   :  { %v816_v40 = vsub.f32 1.5, %v815_v15  ;;  %v801_v43 = vpop.xlane.xlu2 %800 }
 0x510   :  { %v805_v51 = vmul.f32 %v793_v41, %v793_v41  ;;  %v803_v52 = vmul.f32 %v801_v43, %v2427_v35  ;;  %v809_v14 = vsub.f32 %v2415_v24, %v793_v41  ;;  %v2510_v24 = vld [vmem:[%s2811_s2] sm:$0xff] }
 0x511   :  { %v817_v47 = vmul.f32 %v2016_v9, %v816_v40  ;;  %895 = vmatpush.msrb.mxu1 %v2510_v24 }
 0x512   :  { %v807_v57 = vsub.f32 %v803_v52, %v805_v51 }
 0x513   :  { %v821_v56 = vsel %vm820_vm11, %v2016_v9, %v817_v47 }
 0x514   :  { %v832_v60 = vmul.f32 %v821_v56, %v808_v54  ;;  %v811_v29 = vadd.f32 1e-05, %v807_v57 }
 0x516   :  { %v835_v59 = vmul.f32 %v2470_v55, %v832_v60  ;;  %2017 = vrsqrt.f32 %v811_v29  ;;  %vm828_vm13 = vweird.f32 %v811_v29 }
 0x518   :  { %v838_v63 = vadd.f32 %v2479_v61, %v835_v59 }
 0x51a   :  { %1893 = vmatmul.msk.f32.vlgmr.msrb.gmra.mxu0 %vm38_vm0, %v838_v63 }
 0x51c   :  { %v2018_v19 = vpop.eup %2017 }
 0x51d   :  { %v823_v20 = vmul.f32 %v2018_v19, %v811_v29  ;;  %vm829_vm12 = vweird.f32 %v2018_v19 }
 0x51e   :  { %vm830_vm14 = vmor %vm828_vm13, %vm829_vm12 }
 0x51f   :  { %v824_v21 = vmul.f32 %v2018_v19, %v823_v20 }
 0x521   :  { %v825_v22 = vmul.f32 0.5, %v824_v21 }
 0x523   :  { %v826_v23 = vsub.f32 1.5, %v825_v22 }
 0x525   :  { %v827_v46 = vmul.f32 %v2018_v19, %v826_v23 }
 0x527   :  { %v831_v28 = vsel %vm830_vm14, %v2018_v19, %v827_v46 }
 0x528   :  { %v833_v4 = vmul.f32 %v831_v28, %v809_v14 }
 0x52a   :  { %v836_v25 = vmul.f32 %v2470_v55, %v833_v4 }
 0x52c   :  { %v839_v27 = vadd.f32 %v2479_v61, %v836_v25  ;;  %v2063_v25 = vld [vmem:[%s2812_s3] sm:$0xff] }
 0x52e   :  { %1894 = vmatmul.msk.f32.gmra.mxu0 %vm38_vm0, %v839_v27 }
 0x597   :  { %v864_v33 = vpop.f32.mrf.mxu0 }
 0x598   :  { %v865_v26 = vadd.f32 %v864_v33, %v2515_v32 }
 0x59a   :  { %v870_v34 = vmax.f32 %v865_v26, 0.0 }
 0x59c   :  { %1895 = vmatmul.msk.f32.vlgmr.msrb.gmra.mxu1 %vm873_vm15, %v870_v34 }
 0x5ab   :  { %v867_v8 = vpop.f32.mrf.mxu0 }
 0x5ac   :  { %v868_v0 = vadd.f32 %v867_v8, %v2515_v32  ;;  %v2539_v8 = vperm.slane %v2063_v25, 7 }
 0x5ae   :  { %v871_v58 = vmax.f32 %v868_v0, 0.0 }
 0x5b0   :  { %1896 = vmatmul.msk.f32.gmra.mxu1 %vm873_vm15, %v871_v58 }
 0x619   :  { %v897_v12 = vpop.f32.mrf.mxu1 }
 0x61a   :  { %v898_v16 = vadd.f32 %v897_v12, %v2522_v37 }
 0x61c   :  { %v903_v17 = vadd.f32 %v898_v16, %v838_v63 }
 0x61e   :  { %v905_v9 = vsel %vm38_vm0, %v903_v17, 0.0  ;;  %v913_v38 = vmul.f32 %v903_v17, %v903_v17 }
 0x61f   :  { %906 = vadd.xlane.f32.xlu0 %v905_v9 }
 0x620   :  { %v915_v11 = vsel %vm38_vm0, %v913_v38, 0.0 }
 0x621   :  { %916 = vadd.xlane.f32.xlu1 %v915_v11 }
 0x62d   :  { %v900_v15 = vpop.f32.mrf.mxu1 }
 0x62e   :  { %v901_v39 = vadd.f32 %v900_v15, %v2522_v37 }
 0x630   :  { %v904_v40 = vadd.f32 %v901_v39, %v839_v27  ;;  %v2537_v27 = vperm.slane %v2063_v25, 6 }
 0x632   :  { %v908_v41 = vsel %vm38_vm0, %v904_v40, 0.0  ;;  %v914_v43 = vmul.f32 %v904_v40, %v904_v40 }
 0x633   :  { %909 = vadd.xlane.f32.xlu2 %v908_v41 }
 0x634   :  { %v918_v6 = vsel %vm38_vm0, %v914_v43, 0.0 }
 0x635   :  { %919 = vadd.xlane.f32.xlu0 %v918_v6 }
 0x692   :  { %v907_v47 = vpop.xlane.xlu0 %906 }
 0x693   :  { %v911_v51 = vmul.f32 %v907_v47, %v2427_v35 }
 0x694   :  { %v917_v52 = vpop.xlane.xlu1 %916 }
 0x695   :  { %v923_v54 = vmul.f32 %v911_v51, %v911_v51  ;;  %v921_v56 = vmul.f32 %v917_v52, %v2427_v35  ;;  %v927_v4 = vsub.f32 %v903_v17, %v911_v51 }
 0x697   :  { %v925_v57 = vsub.f32 %v921_v56, %v923_v54 }
 0x699   :  { %v929_v60 = vadd.f32 1e-05, %v925_v57 }
 0x69b   :  { %2019 = vrsqrt.f32 %v929_v60  ;;  %vm937_vm3 = vweird.f32 %v929_v60 }
 0x6a1   :  { %v2020_v29 = vpop.eup %2019 }
 0x6a2   :  { %v932_v59 = vmul.f32 %v2020_v29, %v929_v60  ;;  %vm938_vm2 = vweird.f32 %v2020_v29 }
 0x6a3   :  { %vm939_vm4 = vmor %vm937_vm3, %vm938_vm2 }
 0x6a4   :  { %v933_v63 = vmul.f32 %v2020_v29, %v932_v59 }
 0x6a6   :  { %v934_v19 = vmul.f32 0.5, %v933_v63  ;;  %v910_v20 = vpop.xlane.xlu2 %909 }
 0x6a7   :  { %v912_v22 = vmul.f32 %v910_v20, %v2427_v35 }
 0x6a8   :  { %v935_v21 = vsub.f32 1.5, %v934_v19  ;;  %v920_v23 = vpop.xlane.xlu0 %919 }
 0x6a9   :  { %v924_v14 = vmul.f32 %v912_v22, %v912_v22  ;;  %v922_v28 = vmul.f32 %v920_v23, %v2427_v35  ;;  %v928_v39 = vsub.f32 %v904_v40, %v912_v22 }
 0x6aa   :  { %v936_v46 = vmul.f32 %v2020_v29, %v935_v21 }
 0x6ab   :  { %v926_v26 = vsub.f32 %v922_v28, %v924_v14 }
 0x6ac   :  { %v940_v33 = vsel %vm939_vm4, %v2020_v29, %v936_v46 }
 0x6ad   :  { %v951_v34 = vmul.f32 %v940_v33, %v927_v4  ;;  %v930_v0 = vadd.f32 1e-05, %v926_v26 }
 0x6af   :  { %v954_v58 = vmul.f32 %v2537_v27, %v951_v34  ;;  %2021 = vrsqrt.f32 %v930_v0  ;;  %vm947_vm8 = vweird.f32 %v930_v0 }
 0x6b1   :  { %v2543_v12 = vadd.f32 %v2539_v8, %v954_v58 }
 0x6b3   :  { %1897 = vmatmul.msk.f32.vlgmr.msra.gmra.mxu2 %vm38_vm0, %v2543_v12 }
 0x6b5   :  { %v2022_v16 = vpop.eup %2021 }
 0x6b6   :  { %v942_v17 = vmul.f32 %v2022_v16, %v930_v0  ;;  %vm948_vm5 = vweird.f32 %v2022_v16 }
 0x6b7   :  { %vm949_vm9 = vmor %vm947_vm8, %vm948_vm5 }
 0x6b8   :  { %v943_v9 = vmul.f32 %v2022_v16, %v942_v17 }
 0x6ba   :  { %v944_v38 = vmul.f32 0.5, %v943_v9 }
 0x6bc   :  { %v945_v11 = vsub.f32 1.5, %v944_v38 }
 0x6be   :  { %v946_v15 = vmul.f32 %v2022_v16, %v945_v11 }
 0x6c0   :  { %v950_v41 = vsel %vm949_vm9, %v2022_v16, %v946_v15 }
 0x6c1   :  { %v952_v43 = vmul.f32 %v950_v41, %v928_v39 }
 0x6c3   :  { %v955_v6 = vmul.f32 %v2537_v27, %v952_v43 }
 0x6c5   :  { %v2549_v47 = vadd.f32 %v2539_v8, %v955_v6 }
 0x6c7   :  { %1898 = vmatmul.msk.f32.gmra.mxu2 %vm38_vm0, %v2549_v47 }
 0x736   :  { %v982_v51 = vpop.f32.mrf.mxu2 }
 0x737   :  { %v2554_v52 = vadd.f32 %v982_v51, %v2171_v7 }
 0x739   :  { %993 = vrot.lane.b32.xlu2 %v2554_v52, %s2090_s29  ;;  %991 = vrot.lane.b32.xlu1 %v2554_v52, %s2092_s30 }
 0x74a   :  { %v985_v40 = vpop.f32.mrf.mxu2 }
 0x74b   :  { %v2561_v54 = vadd.f32 %v985_v40, %v2171_v7 }
 0x74d   :  { %996 = vrot.lane.b32.xlu2 %v2561_v54, %s2091_s0  ;;  %1000 = vrot.lane.b32.xlu1 %v2561_v54, %s2090_s29 }
 0x74e   :  { %998 = vrot.lane.b32.xlu0 %v2561_v54, %s2092_s30  ;;  %s2100_s30 = smov [#allocation2]  }
 0x755   :  { %1002 = vrot.lane.b32.xlu1 %v2554_v52, %s2093_s5 }
 0x756   :  { %989 = vrot.lane.b32.xlu0 %v2554_v52, %s2091_s0  ;;  %s1853_s0 = sshll.u32 %s2813_s4, 4  ;;  %s1854_s0 = int_to_ptr.hbm [resolvable:$true] %s1853_s0 }
 0x793   :  { %v2573_v56 = vpop.permute.xlu2 %993 }
 0x794   :  { %1080 = vrot.lane.b32.xlu2 %v2573_v56, %s2093_s5 }
 0x7a7   :  { %v2589_v59 = vpop.permute.xlu2 %996 }
 0x7ab   :  { %v2577_v7 = vpop.permute.xlu1 %991 }
 0x7ac   :  { %1054 = vrot.lane.b32.xlu0 %v2577_v7, %s2093_s5 }
 0x7bf   :  { %v2581_v57 = vpop.permute.xlu1 %1000 }
 0x7c0   :  { %v2583_v60 = vpop.permute.xlu0 %998  ;;  %1184 = vrot.lane.b32.xlu0 %v2581_v57, %s2093_s5 }
 0x7c1   :  { %1158 = vrot.lane.b32.xlu1 %v2583_v60, %s2093_s5 }
 0x7c7   :  { %v1003_v29 = vpop.permute.xlu1 %1002 }
 0x7c8   :  { %v2591_v63 = vpop.permute.xlu0 %989  ;;  %1899 = vmatpush.xpose.msk.msra.mxu3 %vm84_vm1, %v1003_v29  ;;  %1106 = vrot.lane.b32.xlu0 %v2561_v54, %s2093_s5 }
 0x7c9   :  { %1132 = vrot.lane.b32.xlu1 %v2589_v59, %s2093_s5  ;;  %1028 = vrot.lane.b32.xlu2 %v2591_v63, %s2093_s5  ;;  %s1851_s5 = sshll.u32 %s2100_s30, 4  ;;  %s1852_s5 = int_to_ptr.vmem [resolvable:$true] %s1851_s5 }
 0x7cb   :  { %1900 = vmatmul.msk.f32.vlgmr.msra.gmra.mxu3 %vm84_vm1, %v2554_v52 }
 0x7ee   :  { %v1081_v19 = vpop.permute.xlu2 %1080 }
 0x7ef   :  { %1905 = vmatpush.xpose.msk.msrb.mxu3 %vm84_vm1, %v1081_v19 }
 0x7f2   :  { %1906 = vmatmul.msk.f32.vlgmr.msrb.gmra.mxu3 %vm84_vm1, %v2573_v56 }
 0x81e   :  { %v1055_v20 = vpop.permute.xlu0 %1054 }
 0x81f   :  { %1903 = vmatpush.xpose.msk.msrb.mxu2 %vm84_vm1, %v1055_v20 }
 0x822   :  { %1904 = vmatmul.msk.f32.vlgmr.msrb.gmra.mxu2 %vm84_vm1, %v2577_v7 }
 0x823   :  { %v1029_v21 = vpop.permute.xlu2 %1028 }
 0x824   :  { %1901 = vmatpush.xpose.msk.msra.mxu0 %vm84_vm1, %v1029_v21 }
 0x827   :  { %1902 = vmatmul.msk.f32.vlgmr.msra.gmra.mxu0 %vm84_vm1, %v2591_v63 }
 0x832   :  { %v1185_v22 = vpop.permute.xlu0 %1184 }
 0x833   :  { %v1159_v23 = vpop.permute.xlu1 %1158  ;;  %1913 = vmatpush.xpose.msk.msra.mxu3 %vm84_vm1, %v1185_v22 }
 0x834   :  { %1911 = vmatpush.xpose.msk.msra.mxu2 %vm84_vm1, %v1159_v23 }
 0x836   :  { %1914 = vmatmul.msk.f32.vlgmr.msra.gmra.mxu3 %vm84_vm1, %v2581_v57 }
 0x837   :  { %1912 = vmatmul.msk.f32.vlgmr.msra.gmra.mxu2 %vm84_vm1, %v2583_v60 }
 0x83a   :  { %v1107_v46 = vpop.permute.xlu0 %1106 }
 0x83b   :  { %v1133_v14 = vpop.permute.xlu1 %1132  ;;  %1907 = vmatpush.xpose.msk.msrb.mxu0 %vm84_vm1, %v1107_v46 }
 0x83c   :  { %1909 = vmatpush.xpose.msk.msra.mxu1 %vm84_vm1, %v1133_v14 }
 0x83e   :  { %1908 = vmatmul.msk.f32.vlgmr.msrb.gmra.mxu0 %vm84_vm1, %v2561_v54 }
 0x83f   :  { %1910 = vmatmul.msk.f32.vlgmr.msra.gmra.mxu1 %vm84_vm1, %v2589_v59 }
 0x84e   :  { %v1025_v28 = vpop.f32.mrf.mxu3 }
 0x84f   :  { %v2626_v9 = vmul.f32 0.35355338, %v1025_v28 }
 0x851   :  { %v1218_v38 = vsel %vm84_vm1, %v2626_v9, -inf }
 0x875   :  { %v1103_v4 = vpop.f32.mrf.mxu3 }
 0x876   :  { %v1213_v25 = vmul.f32 0.35355338, %v1103_v4 }
 0x878   :  { %v1227_v33 = vsel %vm84_vm1, %v1213_v25, -inf }
 0x879   :  { %1228 = vmax.xlane.f32.xlu1 %v1227_v33 }
 0x8a4   :  { %v1051_v26 = vpop.f32.mrf.mxu0 }
 0x8a5   :  { %v1077_v34 = vpop.f32.mrf.mxu2  ;;  %v1211_v0 = vmul.f32 0.35355338, %v1051_v26 }
 0x8a6   :  { %v1212_v58 = vmul.f32 0.35355338, %v1077_v34 }
 0x8a7   :  { %v1221_v16 = vsel %vm84_vm1, %v1211_v0, -inf }
 0x8a8   :  { %v1224_v17 = vsel %vm84_vm1, %v1212_v58, -inf  ;;  %1222 = vmax.xlane.f32.xlu0 %v1221_v16 }
 0x8a9   :  { %1225 = vmax.xlane.f32.xlu2 %v1224_v17 }
 0x8b0   :  { %1219 = vmax.xlane.f32.xlu0 %v1218_v38 }
 0x8b9   :  { %v1207_v11 = vpop.f32.mrf.mxu3 }
 0x8ba   :  { %v1181_v15 = vpop.f32.mrf.mxu2  ;;  %v1217_v39 = vmul.f32 0.35355338, %v1207_v11 }
 0x8bb   :  { %v1216_v41 = vmul.f32 0.35355338, %v1181_v15  ;;  %v1129_v6 = vpop.f32.mrf.mxu0 }
 0x8bc   :  { %v1239_v43 = vsel %vm84_vm1, %v1217_v39, -inf  ;;  %v1155_v40 = vpop.f32.mrf.mxu1  ;;  %v1214_v29 = vmul.f32 0.35355338, %v1129_v6 }
 0x8bd   :  { %v1236_v51 = vsel %vm84_vm1, %v1216_v41, -inf  ;;  %1240 = vmax.xlane.f32.xlu1 %v1239_v43  ;;  %v1215_v19 = vmul.f32 0.35355338, %v1155_v40 }
 0x8be   :  { %1237 = vmax.xlane.f32.xlu2 %v1236_v51  ;;  %v1230_v20 = vsel %vm84_vm1, %v1214_v29, -inf }
 0x8bf   :  { %v1233_v21 = vsel %vm84_vm1, %v1215_v19, -inf }
 0x8c5   :  { %1231 = vmax.xlane.f32.xlu1 %v1230_v20 }
 0x8c6   :  { %1234 = vmax.xlane.f32.xlu2 %v1233_v21 }
 0x8ec   :  { %v1229_v22 = vpop.xlane.xlu1 %1228 }
 0x8ed   :  { %v1245_v23 = vsub.f32 %v1213_v25, %v1229_v22 }
 0x8ef   :  { %v1256_v46 = vmul.f32 1.442695, %v1245_v23 }
 0x8f1   :  { %2023 = vpow2.f32 %v1256_v46 }
 0x8f7   :  { %v2634_v14 = vpop.eup %2023 }
 0x8f8   :  { %v1275_v28 = vsel %vm84_vm1, %v2634_v14, 0.0 }
 0x8f9   :  { %1276 = vadd.xlane.f32.xlu0 %v1275_v28 }
 0x91b   :  { %v1223_v4 = vpop.xlane.xlu0 %1222 }
 0x91c   :  { %v1226_v33 = vpop.xlane.xlu2 %1225  ;;  %v1243_v26 = vsub.f32 %v1211_v0, %v1223_v4 }
 0x91d   :  { %v1244_v34 = vsub.f32 %v1212_v58, %v1226_v33  ;;  %v1966_v33 = vpack.i.bf16 %v2573_v56, %v2577_v7 }
 0x91e   :  { %v1252_v16 = vmul.f32 1.442695, %v1243_v26  ;;  %v1976_v26 = vpack.i.bf16 %v2589_v59, %v2581_v57 }
 0x91f   :  { %v1254_v17 = vmul.f32 1.442695, %v1244_v34 }
 0x920   :  { %2025 = vpow2.f32 %v1252_v16 }
 0x921   :  { %2027 = vpow2.f32 %v1254_v17 }
 0x923   :  { %v1220_v34 = vpop.xlane.xlu0 %1219 }
 0x924   :  { %v1242_v16 = vsub.f32 %v2626_v9, %v1220_v34 }
 0x926   :  { %v2638_v38 = vpop.eup %2025 }
 0x927   :  { %v2640_v11 = vpop.eup %2027  ;;  %v1269_v25 = vsel %vm84_vm1, %v2638_v38, 0.0 }
 0x928   :  { %1270 = vadd.xlane.f32.xlu1 %v1269_v25  ;;  %v1272_v15 = vsel %vm84_vm1, %v2640_v11, 0.0 }
 0x929   :  { %1273 = vadd.xlane.f32.xlu2 %v1272_v15 }
 0x930   :  { %v1241_v43 = vpop.xlane.xlu1 %1240 }
 0x931   :  { %v1238_v6 = vpop.xlane.xlu2 %1237  ;;  %v1249_v0 = vsub.f32 %v1217_v39, %v1241_v43 }
 0x932   :  { %v1248_v58 = vsub.f32 %v1216_v41, %v1238_v6 }
 0x933   :  { %v1264_v51 = vmul.f32 1.442695, %v1249_v0 }
 0x934   :  { %v1262_v40 = vmul.f32 1.442695, %v1248_v58 }
 0x935   :  { %2029 = vpow2.f32 %v1264_v51 }
 0x936   :  { %2031 = vpow2.f32 %v1262_v40 }
 0x938   :  { %v1232_v17 = vpop.xlane.xlu1 %1231 }
 0x939   :  { %v1235_v20 = vpop.xlane.xlu2 %1234 }
 0x93a   :  { %v1247_v21 = vsub.f32 %v1215_v19, %v1235_v20  ;;  %v1971_v19 = vpack.i.bf16 %v2583_v60, %v2591_v63  ;;  %v1250_v60 = vmul.f32 1.442695, %v1242_v16  ;;  %v1246_v63 = vsub.f32 %v1214_v29, %v1232_v17 }
 0x93b   :  { %v2646_v22 = vpop.eup %2029 }
 0x93c   :  { %v2648_v23 = vpop.eup %2031  ;;  %v1260_v46 = vmul.f32 1.442695, %v1247_v21  ;;  %v1287_v28 = vsel %vm84_vm1, %v2646_v22, 0.0  ;;  %v1258_v56 = vmul.f32 1.442695, %v1246_v63 }
 0x93d   :  { %v1284_v4 = vsel %vm84_vm1, %v2648_v23, 0.0  ;;  %1288 = vadd.xlane.f32.xlu0 %v1287_v28 }
 0x93e   :  { %2033 = vpow2.f32 %v1260_v46  ;;  %1285 = vadd.xlane.f32.xlu2 %v1284_v4 }
 0x93f   :  { %2035 = vpow2.f32 %v1250_v60 }
 0x940   :  { %2037 = vpow2.f32 %v1258_v56 }
 0x944   :  { %v2654_v39 = vpop.eup %2033 }
 0x945   :  { %v1281_v41 = vsel %vm84_vm1, %v2654_v39, 0.0  ;;  %v2672_v7 = vpop.eup %2035 }
 0x946   :  { %1282 = vadd.xlane.f32.xlu1 %v1281_v41  ;;  %v1266_v57 = vsel %vm84_vm1, %v2672_v7, 0.0  ;;  %v2676_v59 = vpop.eup %2037 }
 0x951   :  { %1972 = vrot.lane.b32.xlu0 %v1971_v19, %s2094_s6 }
 0x956   :  { %1967 = vrot.lane.b32.xlu2 %v1966_v33, %s2094_s6 }
 0x95f   :  { %1977 = vrot.lane.b32.xlu1 %v1976_v26, %s2094_s6 }
 0x967   :  { %1410 = vrot.lane.b32.xlu1 %v2554_v52, %s2094_s6  ;;  %v1278_v52 = vsel %vm84_vm1, %v2676_v59, 0.0 }
 0x96c   :  { %v1277_v9 = vpop.xlane.xlu0 %1276 }
 0x96d   :  { %2039 = vrcp.f32 %v1277_v9  ;;  %v1346_v28 = vand.u32 2147483648, %v1277_v9  ;;  %vm1340_vm12 = vweird.f32 %v1277_v9  ;;  %v1344_v33 = vand.u32 2147483647, %v1277_v9 }
 0x96f   :  { %1514 = vrot.lane.b32.xlu1 %v2561_v54, %s2094_s6  ;;  %v1347_v60 = vor.u32 1.1754944e-38, %v1346_v28  ;;  %vm1345_vm3 = vcmp.eq.f32.partialorder %v1344_v33, 8.507059e+37  ;;  %s2101_s6 = smov 128  }
 0x973   :  { %v2040_v54 = vpop.eup %2039 }
 0x974   :  { %v1336_v43 = vmul.f32 %v2040_v54, %v1277_v9  ;;  %vm1341_vm10 = vweird.f32 %v2040_v54 }
 0x975   :  { %vm1342_vm13 = vmor %vm1340_vm12, %vm1341_vm10 }
 0x976   :  { %v1337_v0 = vsub.f32 1.0, %v1336_v43 }
 0x978   :  { %v1338_v40 = vmul.f32 %v2040_v54, %v1337_v0 }
 0x97a   :  { %v1339_v46 = vadd.f32 %v2040_v54, %v1338_v40 }
 0x97b   :  { %1267 = vadd.xlane.f32.xlu0 %v1266_v57 }
 0x97c   :  { %v1343_v17 = vsel %vm1342_vm13, %v2040_v54, %v1339_v46 }
 0x97d   :  { %v1348_v57 = vsel %vm1345_vm3, %v1347_v60, %v1343_v17 }
 0x97f   :  { %1279 = vadd.xlane.f32.xlu2 %v1278_v52 }
 0x99b   :  { %v2680_v15 = vpop.xlane.xlu1 %1270 }
 0x99c   :  { %v1274_v29 = vpop.xlane.xlu2 %1273  ;;  %vm1310_vm8 = vweird.f32 %v2680_v15  ;;  %v1314_v28 = vand.u32 2147483647, %v2680_v15 }
 0x99d   :  { %2041 = vrcp.f32 %v1274_v29  ;;  %v1331_v26 = vand.u32 2147483648, %v1274_v29  ;;  %vm1325_vm14 = vweird.f32 %v1274_v29  ;;  %v1329_v16 = vand.u32 2147483647, %v1274_v29 }
 0x99e   :  { %2043 = vrcp.f32 %v2680_v15  ;;  %vm1315_vm12 = vcmp.eq.f32.partialorder %v1314_v28, 8.507059e+37 }
 0x99f   :  { %v1332_v56 = vor.u32 1.1754944e-38, %v1331_v26  ;;  %vm1330_vm4 = vcmp.eq.f32.partialorder %v1329_v16, 8.507059e+37 }
 0x9a3   :  { %v2042_v25 = vpop.eup %2041 }
 0x9a4   :  { %v1321_v6 = vmul.f32 %v2042_v25, %v1274_v29  ;;  %v2683_v51 = vpop.eup %2043  ;;  %vm1326_vm11 = vweird.f32 %v2042_v25 }
 0x9a5   :  { %v1306_v21 = vmul.f32 %v2683_v51, %v2680_v15  ;;  %vm1327_vm2 = vmor %vm1325_vm14, %vm1326_vm11  ;;  %vm1311_vm5 = vweird.f32 %v2683_v51 }
 0x9a6   :  { %v1322_v58 = vsub.f32 1.0, %v1321_v6  ;;  %vm1312_vm10 = vmor %vm1310_vm8, %vm1311_vm5 }
 0x9a7   :  { %v1307_v34 = vsub.f32 1.0, %v1306_v21 }
 0x9a8   :  { %v1323_v20 = vmul.f32 %v2042_v25, %v1322_v58 }
 0x9a9   :  { %v1308_v52 = vmul.f32 %v2683_v51, %v1307_v34 }
 0x9aa   :  { %v1324_v4 = vadd.f32 %v2042_v25, %v1323_v20 }
 0x9ab   :  { %v1309_v20 = vadd.f32 %v2683_v51, %v1308_v52 }
 0x9ac   :  { %v1328_v63 = vsel %vm1327_vm2, %v2042_v25, %v1324_v4  ;;  %v1349_v25 = vmul.f32 %v2634_v14, %v1348_v57  ;;  %v1316_v4 = vand.u32 2147483648, %v2680_v15 }
 0x9ad   :  { %v1333_v9 = vsel %vm1330_vm4, %v1332_v56, %v1328_v63 }
 0x9ae   :  { %v1334_v46 = vmul.f32 %v2640_v11, %v1333_v9  ;;  %v1313_v11 = vsel %vm1312_vm10, %v2683_v51, %v1309_v20  ;;  %v1317_v17 = vor.u32 1.1754944e-38, %v1316_v4 }
 0x9b0   :  { %v2687_v19 = vpop.xlane.xlu0 %1288  ;;  %v1318_v52 = vsel %vm1315_vm12, %v1317_v17, %v1313_v11 }
 0x9b1   :  { %v1286_v41 = vpop.xlane.xlu2 %1285  ;;  %vm1400_vm4 = vweird.f32 %v2687_v19 }
 0x9b2   :  { %2045 = vrcp.f32 %v1286_v41  ;;  %v1391_v33 = vand.u32 2147483648, %v1286_v41  ;;  %v1389_v34 = vand.u32 2147483647, %v1286_v41  ;;  %vm1385_vm11 = vweird.f32 %v1286_v41 }
 0x9b3   :  { %2047 = vrcp.f32 %v2687_v19 }
 0x9b4   :  { %v1392_v60 = vor.u32 1.1754944e-38, %v1391_v33  ;;  %vm1390_vm14 = vcmp.eq.f32.partialorder %v1389_v34, 8.507059e+37 }
 0x9b8   :  { %v2046_v43 = vpop.eup %2045 }
 0x9b9   :  { %v1381_v6 = vmul.f32 %v2046_v43, %v1286_v41  ;;  %v1968_v0 = vpop.permute.xlu2 %1967  ;;  %v2691_v58 = vpop.xlane.xlu1 %1282  ;;  %vm1386_vm9 = vweird.f32 %v2046_v43  ;;  %v1319_v41 = vmul.f32 %v2638_v38, %v1318_v52  ;;  %v1406_v38 = vand.u32 2147483648, %v2687_v19 }
 0x9ba   :  { %v2693_v40 = vpop.eup %2047  ;;  %v1970_v29 = vunpack.i.h.bf16 %v1968_v0  ;;  %v1969_v54 = vunpack.i.l.bf16 %v1968_v0  ;;  %2049 = vrcp.f32 %v2691_v58  ;;  %vm1387_vm13 = vmor %vm1385_vm11, %vm1386_vm9  ;;  %vm1370_vm8 = vweird.f32 %v2691_v58 }
 0x9bb   :  { %v1382_v21 = vsub.f32 1.0, %v1381_v6  ;;  %v1396_v14 = vmul.f32 %v2693_v40, %v2687_v19  ;;  %vm1401_vm2 = vweird.f32 %v2693_v40  ;;  %v1374_v28 = vand.u32 2147483647, %v2691_v58 }
 0x9bc   :  { %1483 = vmatpush.msrb.mxu2 %v1969_v54  ;;  %1509 = vmatpush.msrb.mxu3 %v1970_v29  ;;  %vm1402_vm5 = vmor %vm1400_vm4, %vm1401_vm2  ;;  %v1407_v33 = vor.u32 1.1754944e-38, %v1406_v38 }
 0x9bd   :  { %v1383_v26 = vmul.f32 %v2046_v43, %v1382_v21  ;;  %1917 = vmatmul.msk.f32.vlgmr.msrb.gmra.mxu2 %vm84_vm1, %v1334_v46  ;;  %1918 = vmatmul.msk.f32.vlgmr.msrb.gmra.mxu3 %vm84_vm1, %v1349_v25  ;;  %v1397_v56 = vsub.f32 1.0, %v1396_v14  ;;  %v1404_v46 = vand.u32 2147483647, %v2687_v19  ;;  %vm1375_vm11 = vcmp.eq.f32.partialorder %v1374_v28, 8.507059e+37 }
 0x9bf   :  { %v1384_v16 = vadd.f32 %v2046_v43, %v1383_v26  ;;  %v1398_v51 = vmul.f32 %v2693_v40, %v1397_v56  ;;  %vm1405_vm10 = vcmp.eq.f32.partialorder %v1404_v46, 8.507059e+37 }
 0x9c0   :  { %v2050_v15 = vpop.eup %2049 }
 0x9c1   :  { %v1388_v63 = vsel %vm1387_vm13, %v2046_v43, %v1384_v16  ;;  %v1366_v57 = vmul.f32 %v2050_v15, %v2691_v58  ;;  %v1399_v43 = vadd.f32 %v2693_v40, %v1398_v51  ;;  %vm1371_vm3 = vweird.f32 %v2050_v15 }
 0x9c2   :  { %v1393_v9 = vsel %vm1390_vm14, %v1392_v60, %v1388_v63  ;;  %vm1372_vm9 = vmor %vm1370_vm8, %vm1371_vm3 }
 0x9c3   :  { %v1367_v6 = vsub.f32 1.0, %v1366_v57  ;;  %v1973_v0 = vpop.permute.xlu0 %1972  ;;  %v1394_v20 = vmul.f32 %v2648_v23, %v1393_v9  ;;  %v1376_v23 = vand.u32 2147483648, %v2691_v58 }
 0x9c4   :  { %v1975_v29 = vunpack.i.h.bf16 %v1973_v0  ;;  %v1974_v54 = vunpack.i.l.bf16 %v1973_v0 }
 0x9c5   :  { %v1368_v25 = vmul.f32 %v2050_v15, %v1367_v6  ;;  %v1377_v26 = vor.u32 1.1754944e-38, %v1376_v23 }
 0x9c6   :  { %1457 = vmatpush.msrb.mxu1 %v1974_v54  ;;  %1587 = vmatpush.msra.mxu2 %v1975_v29 }
 0x9c7   :  { %1916 = vmatmul.msk.f32.vlgmr.msrb.gmra.mxu1 %vm84_vm1, %v1319_v41  ;;  %1921 = vmatmul.msk.f32.vlgmr.msra.gmra.mxu2 %vm84_vm1, %v1394_v20  ;;  %v1369_v21 = vadd.f32 %v2050_v15, %v1368_v25 }
 0x9c8   :  { %1776 = vmatpush.msrb.mxu2 %v2454_v42  ;;  %v1403_v42 = vsel %vm1402_vm5, %v2693_v40, %v1399_v43 }
 0x9c9   :  { %v1373_v4 = vsel %vm1372_vm9, %v2050_v15, %v1369_v21 }
 0x9ca   :  { %1777 = vmatpush.msrb.mxu2 %v2459_v18  ;;  %v1408_v18 = vsel %vm1405_vm10, %v1407_v33, %v1403_v42  ;;  %v1378_v34 = vsel %vm1375_vm11, %v1377_v26, %v1373_v4 }
 0x9cb   :  { %v1409_v58 = vmul.f32 %v2646_v22, %v1408_v18 }
 0x9cc   :  { %1778 = vmatpush.msrb.mxu2 %v2466_v53  ;;  %v1379_v53 = vmul.f32 %v2654_v39, %v1378_v34 }
 0x9ce   :  { %1779 = vmatpush.msrb.mxu2 %v2476_v45 }
 0x9d0   :  { %1780 = vmatpush.msrb.mxu2 %v2485_v62 }
 0x9d1   :  { %v1978_v19 = vpop.permute.xlu1 %1977 }
 0x9d2   :  { %v1980_v14 = vunpack.i.h.bf16 %v1978_v19  ;;  %v1979_v11 = vunpack.i.l.bf16 %v1978_v19  ;;  %1781 = vmatpush.msrb.mxu2 %v2499_v30 }
 0x9d4   :  { %1561 = vmatpush.msra.mxu1 %v1980_v14  ;;  %1613 = vmatpush.msra.mxu3 %v1979_v11 }
 0x9d5   :  { %1920 = vmatmul.msk.f32.vlgmr.msra.gmra.mxu1 %vm84_vm1, %v1379_v53  ;;  %1922 = vmatmul.msk.f32.vlgmr.msra.gmra.mxu3 %vm84_vm1, %v1409_v58 }
 0x9d6   :  { %1749 = vmatpush.msrb.mxu1 %v2425_v5  ;;  %1782 = vmatpush.msrb.mxu2 %v2504_v31 }
 0x9d8   :  { %1750 = vmatpush.msrb.mxu1 %v2433_v36  ;;  %1783 = vmatpush.msrb.mxu2 %v2510_v24 }
 0x9d9   :  { %v1411_v45 = vpop.permute.xlu1 %1410 }
 0x9da   :  { %1431 = vmatpush.msra.mxu0 %v1411_v45  ;;  %1751 = vmatpush.msrb.mxu1 %v2440_v1 }
 0x9dc   :  { %1752 = vmatpush.msrb.mxu1 %v2447_v13 }
 0x9e1   :  { %v1515_v62 = vpop.permute.xlu1 %1514 }
 0x9e2   :  { %1535 = vmatpush.msrb.mxu0 %v1515_v62 }
 0x9ee   :  { %v1268_v30 = vpop.xlane.xlu0 %1267 }
 0x9ef   :  { %2051 = vrcp.f32 %v1268_v30  ;;  %v1301_v16 = vand.u32 2147483648, %v1268_v30  ;;  %v1299_v24 = vand.u32 2147483647, %v1268_v30  ;;  %vm1295_vm13 = vweird.f32 %v1268_v30 }
 0x9f1   :  { %v1302_v13 = vor.u32 1.1754944e-38, %v1301_v16  ;;  %vm1300_vm2 = vcmp.eq.f32.partialorder %v1299_v24, 8.507059e+37 }
 0x9f2   :  { %v1280_v22 = vpop.xlane.xlu2 %1279 }
 0x9f3   :  { %2053 = vrcp.f32 %v1280_v22  ;;  %v1361_v57 = vand.u32 2147483648, %v1280_v22  ;;  %vm1355_vm4 = vweird.f32 %v1280_v22  ;;  %v1359_v9 = vand.u32 2147483647, %v1280_v22 }
 0x9f5   :  { %v2052_v39 = vpop.eup %2051  ;;  %v1362_v29 = vor.u32 1.1754944e-38, %v1361_v57  ;;  %vm1360_vm8 = vcmp.eq.f32.partialorder %v1359_v9, 8.507059e+37 }
 0x9f6   :  { %v1291_v5 = vmul.f32 %v2052_v39, %v1268_v30  ;;  %vm1296_vm12 = vweird.f32 %v2052_v39 }
 0x9f7   :  { %vm1297_vm14 = vmor %vm1295_vm13, %vm1296_vm12 }
 0x9f8   :  { %v1292_v40 = vsub.f32 1.0, %v1291_v5 }
 0x9f9   :  { %v2054_v31 = vpop.eup %2053 }
 0x9fa   :  { %v1293_v36 = vmul.f32 %v2052_v39, %v1292_v40  ;;  %v1351_v15 = vmul.f32 %v2054_v31, %v1280_v22  ;;  %vm1356_vm3 = vweird.f32 %v2054_v31 }
 0x9fb   :  { %vm1357_vm5 = vmor %vm1355_vm4, %vm1356_vm3 }
 0x9fc   :  { %v1294_v17 = vadd.f32 %v2052_v39, %v1293_v36  ;;  %v1352_v1 = vsub.f32 1.0, %v1351_v15 }
 0x9fe   :  { %v1298_v60 = vsel %vm1297_vm14, %v2052_v39, %v1294_v17  ;;  %v1353_v63 = vmul.f32 %v2054_v31, %v1352_v1 }
 0x9ff   :  { %v1303_v56 = vsel %vm1300_vm2, %v1302_v13, %v1298_v60 }
 0xa00   :  { %v1354_v52 = vadd.f32 %v2054_v31, %v1353_v63  ;;  %v1304_v6 = vmul.f32 %v2672_v7, %v1303_v56 }
 0xa02   :  { %v1358_v0 = vsel %vm1357_vm5, %v2054_v31, %v1354_v52  ;;  %1915 = vmatmul.msk.f32.vlgmr.msra.gmra.mxu0 %vm84_vm1, %v1304_v6 }
 0xa03   :  { %1666 = vmatpush.msra.mxu0 %v1959_v44  ;;  %v1363_v54 = vsel %vm1360_vm8, %v1362_v29, %v1358_v0 }
 0xa04   :  { %v1364_v51 = vmul.f32 %v2676_v59, %v1363_v54 }
 0xa05   :  { %1667 = vmatpush.msra.mxu0 %v1960_v3 }
 0xa07   :  { %1668 = vmatpush.msra.mxu0 %v1964_v50 }
 0xa09   :  { %1669 = vmatpush.msra.mxu0 %v1965_v49 }
 0xa0a   :  { %1919 = vmatmul.msk.f32.vlgmr.msrb.gmra.mxu0 %vm84_vm1, %v1364_v51 }
 0xa40   :  { %v1511_v7 = vpop.f32.mrf.mxu3  ;;  %v1485_v25 = vpop.f32.mrf.mxu2 }
 0xa41   :  { %1627 = vrot.lane.b32.xlu0 %v1511_v7, %s2097_s9 }
 0xa44   :  { %v1459_v44 = vpop.f32.mrf.mxu1 }
 0xa45   :  { %1619 = vrot.lane.b32.xlu1 %v1459_v44, %s2096_s8 }
 0xa4a   :  { %v1589_v41 = vpop.f32.mrf.mxu2 }
 0xa4b   :  { %1638 = vrot.lane.b32.xlu2 %v1589_v41, %s2098_s10 }
 0xa4d   :  { %1623 = vrot.lane.b32.xlu1 %v1485_v25, %s2098_s10 }
 0xa52   :  { %v1563_v2 = vpop.f32.mrf.mxu1 }
 0xa55   :  { %1634 = vrot.lane.b32.xlu1 %v1563_v2, %s2096_s8 }
 0xa58   :  { %v1615_v3 = vpop.f32.mrf.mxu3 }
 0xa5d   :  { %1642 = vrot.lane.b32.xlu1 %v1615_v3, %s2097_s9 }
 0xa7f   :  { %v1433_v49 = vpop.f32.mrf.mxu0 }
 0xa87   :  { %v1537_v23 = vpop.f32.mrf.mxu0 }
 0xaa5   :  { %v1639_v28 = vpop.permute.xlu2 %1638 }
 0xab3   :  { %v1628_v20 = vpop.permute.xlu0 %1627 }
 0xab7   :  { %v1620_v48 = vpop.permute.xlu1 %1619 }
 0xab8   :  { %v1630_v50 = vsel %vm84_vm1, %v1433_v49, %v1620_v48 }
 0xabf   :  { %v1624_v59 = vpop.permute.xlu1 %1623 }
 0xac0   :  { %v1631_v43 = vsel %vm712_vm6, %v1630_v50, %v1624_v59 }
 0xac1   :  { %v1632_v21 = vsel %vm714_vm7, %v1631_v43, %v1628_v20 }
 0xac2   :  { %1923 = vmatmul.msk.f32.vlgmr.msra.gmra.mxu0 %vm38_vm0, %v1632_v21 }
 0xac7   :  { %v1635_v38 = vpop.permute.xlu1 %1634 }
 0xac8   :  { %v1645_v46 = vsel %vm84_vm1, %v1537_v23, %v1635_v38 }
 0xac9   :  { %v1646_v4 = vsel %vm712_vm6, %v1645_v46, %v1639_v28 }
 0xacf   :  { %v1643_v42 = vpop.permute.xlu1 %1642 }
 0xad0   :  { %v1647_v33 = vsel %vm714_vm7, %v1646_v4, %v1643_v42 }
 0xad1   :  { %1924 = vmatmul.msk.f32.gmra.mxu0 %vm38_vm0, %v1647_v33 }
 0xb3f   :  { %v1671_v26 = vpop.f32.mrf.mxu0 }
 0xb40   :  { %v1672_v18 = vadd.f32 %v1671_v26, %v2402_v10 }
 0xb42   :  { %v1677_v34 = vadd.f32 %v1672_v18, %v2543_v12 }
 0xb44   :  { %v1679_v19 = vsel %vm38_vm0, %v1677_v34, 0.0  ;;  %v1687_v14 = vmul.f32 %v1677_v34, %v1677_v34 }
 0xb45   :  { %1680 = vadd.xlane.f32.xlu1 %v1679_v19 }
 0xb46   :  { %v1689_v11 = vsel %vm38_vm0, %v1687_v14, 0.0 }
 0xb47   :  { %1690 = vadd.xlane.f32.xlu0 %v1689_v11 }
 0xb4e   :  { %v1674_v53 = vpop.f32.mrf.mxu0 }
 0xb4f   :  { %v1675_v58 = vadd.f32 %v1674_v53, %v2402_v10 }
 0xb51   :  { %v1678_v45 = vadd.f32 %v1675_v58, %v2549_v47 }
 0xb53   :  { %v1682_v62 = vsel %vm38_vm0, %v1678_v45, 0.0  ;;  %v1688_v30 = vmul.f32 %v1678_v45, %v1678_v45 }
 0xb54   :  { %1683 = vadd.xlane.f32.xlu2 %v1682_v62 }
 0xb55   :  { %v1692_v22 = vsel %vm38_vm0, %v1688_v30, 0.0 }
 0xb56   :  { %1693 = vadd.xlane.f32.xlu1 %v1692_v22 }
 0xbb8   :  { %v1681_v12 = vpop.xlane.xlu1 %1680 }
 0xbb9   :  { %v1685_v39 = vmul.f32 %v1681_v12, %v2427_v35 }
 0xbba   :  { %v1691_v5 = vpop.xlane.xlu0 %1690 }
 0xbbb   :  { %v1697_v40 = vmul.f32 %v1685_v39, %v1685_v39  ;;  %v1695_v31 = vmul.f32 %v1691_v5, %v2427_v35  ;;  %v1701_v6 = vsub.f32 %v1677_v34, %v1685_v39 }
 0xbbd   :  { %v1699_v16 = vsub.f32 %v1695_v31, %v1697_v40 }
 0xbbf   :  { %v1703_v36 = vadd.f32 1e-05, %v1699_v16 }
 0xbc1   :  { %2055 = vrsqrt.f32 %v1703_v36  ;;  %vm1711_vm6 = vweird.f32 %v1703_v36 }
 0xbc7   :  { %v2056_v10 = vpop.eup %2055  ;;  %v1684_v24 = vpop.xlane.xlu2 %1683 }
 0xbc8   :  { %v1706_v47 = vmul.f32 %v2056_v10, %v1703_v36  ;;  %v1686_v15 = vmul.f32 %v1684_v24, %v2427_v35  ;;  %vm1712_vm1 = vweird.f32 %v2056_v10 }
 0xbc9   :  { %v1694_v17 = vpop.xlane.xlu1 %1693  ;;  %vm1713_vm7 = vmor %vm1711_vm6, %vm1712_vm1 }
 0xbca   :  { %v1707_v1 = vmul.f32 %v2056_v10, %v1706_v47  ;;  %v1698_v13 = vmul.f32 %v1686_v15, %v1686_v15  ;;  %v1696_v60 = vmul.f32 %v1694_v17, %v2427_v35  ;;  %v1702_v48 = vsub.f32 %v1678_v45, %v1686_v15 }
 0xbcc   :  { %v1708_v63 = vmul.f32 0.5, %v1707_v1  ;;  %v1700_v56 = vsub.f32 %v1696_v60, %v1698_v13 }
 0xbce   :  { %v1709_v57 = vsub.f32 1.5, %v1708_v63  ;;  %v1704_v52 = vadd.f32 1e-05, %v1700_v56 }
 0xbd0   :  { %v1710_v9 = vmul.f32 %v2056_v10, %v1709_v57  ;;  %2057 = vrsqrt.f32 %v1704_v52  ;;  %vm1721_vm10 = vweird.f32 %v1704_v52 }
 0xbd2   :  { %v1714_v0 = vsel %vm1713_vm7, %v2056_v10, %v1710_v9 }
 0xbd3   :  { %v1725_v29 = vmul.f32 %v1714_v0, %v1701_v6 }
 0xbd5   :  { %v1727_v54 = vmul.f32 %v1725_v29, %v2470_v55 }
 0xbd6   :  { %v2058_v51 = vpop.eup %2057 }
 0xbd7   :  { %v1716_v7 = vmul.f32 %v2058_v51, %v1704_v52  ;;  %v1729_v25 = vadd.f32 %v1727_v54, %v2479_v61  ;;  %vm1722_vm9 = vweird.f32 %v2058_v51 }
 0xbd8   :  { %vm1723_vm11 = vmor %vm1721_vm10, %vm1722_vm9 }
 0xbd9   :  { %v1717_v44 = vmul.f32 %v2058_v51, %v1716_v7  ;;  %1925 = vmatmul.msk.f32.vlgmr.msrb.gmra.mxu1 %vm38_vm0, %v1729_v25 }
 0xbdb   :  { %v1718_v41 = vmul.f32 0.5, %v1717_v44 }
 0xbdd   :  { %v1719_v2 = vsub.f32 1.5, %v1718_v41 }
 0xbdf   :  { %v1720_v3 = vmul.f32 %v2058_v51, %v1719_v2 }
 0xbe1   :  { %v1724_v49 = vsel %vm1723_vm11, %v2058_v51, %v1720_v3 }
 0xbe2   :  { %v1726_v50 = vmul.f32 %v1724_v49, %v1702_v48 }
 0xbe4   :  { %v1728_v59 = vmul.f32 %v1726_v50, %v2470_v55 }
 0xbe6   :  { %v1730_v20 = vadd.f32 %v1728_v59, %v2479_v61 }
 0xbe8   :  { %1926 = vmatmul.msk.f32.gmra.mxu1 %vm38_vm0, %v1730_v20 }
 0xc56   :  { %v1754_v43 = vpop.f32.mrf.mxu1 }
 0xc57   :  { %v1755_v21 = vadd.f32 %v1754_v43, %v2515_v32 }
 0xc59   :  { %v1760_v38 = vmax.f32 %v1755_v21, 0.0 }
 0xc5b   :  { %1927 = vmatmul.msk.f32.vlgmr.msrb.gmra.mxu2 %vm873_vm15, %v1760_v38 }
 0xc65   :  { %v1757_v23 = vpop.f32.mrf.mxu1 }
 0xc66   :  { %v1758_v46 = vadd.f32 %v1757_v23, %v2515_v32 }
 0xc68   :  { %v1761_v28 = vmax.f32 %v1758_v46, 0.0 }
 0xc6a   :  { %1928 = vmatmul.msk.f32.gmra.mxu2 %vm873_vm15, %v1761_v28 }
 0xcde   :  { %v1785_v42 = vpop.f32.mrf.mxu2 }
 0xcdf   :  { %v1786_v4 = vadd.f32 %v1785_v42, %v2522_v37 }
 0xce1   :  { %v1791_v55 = vadd.f32 %v1786_v4, %v1729_v25 }
 0xce3   :  { %v1793_v61 = vsel %vm38_vm0, %v1791_v55, 0.0  ;;  %v1801_v33 = vmul.f32 %v1791_v55, %v1791_v55 }
 0xce4   :  { %1794 = vadd.xlane.f32.xlu0 %v1793_v61 }
 0xce5   :  { %v1803_v26 = vsel %vm38_vm0, %v1801_v33, 0.0 }
 0xce6   :  { %1804 = vadd.xlane.f32.xlu1 %v1803_v26 }
 0xced   :  { %v1788_v18 = vpop.f32.mrf.mxu2 }
 0xcee   :  { %v1789_v34 = vadd.f32 %v1788_v18, %v2522_v37 }
 0xcf0   :  { %v1792_v19 = vadd.f32 %v1789_v34, %v1730_v20 }
 0xcf2   :  { %v1796_v32 = vsel %vm38_vm0, %v1792_v19, 0.0  ;;  %v1802_v14 = vmul.f32 %v1792_v19, %v1792_v19 }
 0xcf3   :  { %1797 = vadd.xlane.f32.xlu2 %v1796_v32 }
 0xcf4   :  { %v1806_v11 = vsel %vm38_vm0, %v1802_v14, 0.0 }
 0xcf5   :  { %1807 = vadd.xlane.f32.xlu0 %v1806_v11 }
 0xd57   :  { %v1795_v53 = vpop.xlane.xlu0 %1794 }
 0xd58   :  { %v1799_v58 = vmul.f32 %v1795_v53, %v2427_v35 }
 0xd59   :  { %v1805_v45 = vpop.xlane.xlu1 %1804 }
 0xd5a   :  { %v1811_v62 = vmul.f32 %v1799_v58, %v1799_v58  ;;  %v1809_v30 = vmul.f32 %v1805_v45, %v2427_v35  ;;  %v1815_v13 = vsub.f32 %v1791_v55, %v1799_v58 }
 0xd5c   :  { %v1813_v22 = vsub.f32 %v1809_v30, %v1811_v62 }
 0xd5e   :  { %v1817_v12 = vadd.f32 1e-05, %v1813_v22 }
 0xd60   :  { %2059 = vrsqrt.f32 %v1817_v12  ;;  %vm1825_vm12 = vweird.f32 %v1817_v12 }
 0xd66   :  { %v2060_v39 = vpop.eup %2059  ;;  %v1798_v37 = vpop.xlane.xlu2 %1797 }
 0xd67   :  { %v1820_v5 = vmul.f32 %v2060_v39, %v1817_v12  ;;  %v1800_v40 = vmul.f32 %v1798_v37, %v2427_v35  ;;  %vm1826_vm15 = vweird.f32 %v2060_v39 }
 0xd68   :  { %v1808_v31 = vpop.xlane.xlu0 %1807  ;;  %vm1827_vm13 = vmor %vm1825_vm12, %vm1826_vm15 }
 0xd69   :  { %v1821_v16 = vmul.f32 %v2060_v39, %v1820_v5  ;;  %v1812_v36 = vmul.f32 %v1800_v40, %v1800_v40  ;;  %v1810_v10 = vmul.f32 %v1808_v31, %v2427_v35  ;;  %v1816_v54 = vsub.f32 %v1792_v19, %v1800_v40 }
 0xd6b   :  { %v1822_v24 = vmul.f32 0.5, %v1821_v16  ;;  %v1814_v47 = vsub.f32 %v1810_v10, %v1812_v36 }
 0xd6d   :  { %v1823_v15 = vsub.f32 1.5, %v1822_v24  ;;  %v1818_v17 = vadd.f32 1e-05, %v1814_v47 }
 0xd6f   :  { %v1824_v1 = vmul.f32 %v2060_v39, %v1823_v15  ;;  %2061 = vrsqrt.f32 %v1818_v17  ;;  %vm1835_vm2 = vweird.f32 %v1818_v17 }
 0xd71   :  { %v1828_v60 = vsel %vm1827_vm13, %v2060_v39, %v1824_v1 }
 0xd72   :  { %v1839_v63 = vmul.f32 %v1828_v60, %v1815_v13 }
 0xd74   :  { %v1841_v56 = vmul.f32 %v1839_v63, %v2537_v27 }
 0xd75   :  { %v2062_v57 = vpop.eup %2061 }
 0xd76   :  { %v1830_v52 = vmul.f32 %v2062_v57, %v1818_v17  ;;  %v1843_v9 = vadd.f32 %v1841_v56, %v2539_v8  ;;  %vm1836_vm14 = vweird.f32 %v2062_v57 }
 0xd77   :  { %vm1837_vm3 = vmor %vm1835_vm2, %vm1836_vm14 }
 0xd78   :  { %v1831_v6 = vmul.f32 %v2062_v57, %v1830_v52  ;;  %1845 = vst.msk [vmem:[#allocation2] sm:$0xff] %vm38_vm0, %v1843_v9 }
 0xd7a   :  { %v1832_v35 = vmul.f32 0.5, %v1831_v6 }
 0xd7c   :  { %v1833_v0 = vsub.f32 1.5, %v1832_v35 }
 0xd7e   :  { %v1834_v29 = vmul.f32 %v2062_v57, %v1833_v0 }
 0xd80   :  { %v1838_v51 = vsel %vm1837_vm3, %v2062_v57, %v1834_v29 }
 0xd81   :  { %v1840_v7 = vmul.f32 %v1838_v51, %v1816_v54 }
 0xd83   :  { %v1842_v25 = vmul.f32 %v1840_v7, %v2537_v27 }
 0xd85   :  { %v1844_v44 = vadd.f32 %v1842_v25, %v2539_v8 }
 0xd87   :  { %1846 = vst.msk [vmem:[#allocation2 + $0x8] sm:$0xff] %vm38_vm0, %v1844_v44 }
 0xd88   :  { %1859 = dma.vmem_to_hbm [thread:$0]  %s1852_s5, 256, %s1854_s0, [#allocation3], %s2101_s6, %s2101_s6, %s2096_s8  }
 0xd89   :  { %2088 = dma.done.wait [#allocation3], 256  }
 0xd8a   :  { %2089 = vsyncadd [#allocation3], 4294967040 }
 0xd8b   :  { %1864 = vsyncpa [#allocation3], 1 }

</bundles_post_ra>
